<compile_context>
chip_gen: v6e
topology: v6e:2x2x1
jax: 0.10.0
libtpu: 0.0.40
codegen_flags: <defaults>
</compile_context>

<pallas_src>
import functools

import jax
import jax.numpy as jnp
from jax import lax
from jax.experimental import pallas as pl
from jax.experimental.pallas import tpu as pltpu


def _round_up(x, m):
    return (x + m - 1) // m * m


# ---------------------------------------------------------------------------
# Kernel
# ---------------------------------------------------------------------------
def _net_kernel(x_ref, w1_ref, b1_ref, w2_ref, b2_ref,
                fc1w_ref, fc1b_ref, fc2w_ref, fc2b_ref, out_ref,
                scr1, scrh1, scr2, scrh2):
    tb = x_ref.shape[0]
    zpad1 = jnp.zeros((tb, 24, 100), jnp.bfloat16)

    # ---- conv1 (1 -> 10, 5x5 VALID): five 128-lane-aligned ky strips -> one matmul ----
    parts = []
    for ky in range(5):
        parts.append(x_ref[:, ky:ky + 24, :].astype(jnp.bfloat16))   # (TB, 24, 28)
        parts.append(zpad1)                                          # zero lanes 28..127
    xs = jnp.concatenate(parts, axis=-1).reshape(tb * 24, 640)       # (TB*24, 640) bf16
    c1 = jnp.dot(xs, w1_ref[...], preferred_element_type=jnp.float32)  # (TB*24, 256) f32

    # 2x2 max-pool: columns via lane-aligned parity halves, rows via stride-2 sublane reads.
    p1 = jnp.maximum(c1[:, :128], c1[:, 128:])                       # (TB*24, 128)
    scr1[...] = p1.reshape(tb, 24, 128)
    h1 = jnp.maximum(scr1[:, pl.ds(0, 12, 2), :],
                     scr1[:, pl.ds(1, 12, 2), :])                    # (TB, 12, 128)
    scrh1[...] = jnp.maximum(h1 + b1_ref[...], 0.0)                  # + bias, relu

    # ---- conv2 (10 -> 20, 5x5 VALID); Dropout2d == identity in eval ----
    hs = jnp.concatenate([scrh1[:, ky:ky + 8, :] for ky in range(5)], axis=-1)  # (TB, 8, 640)
    hs = hs.reshape(tb * 8, 640).astype(jnp.bfloat16)
    c2 = jnp.dot(hs, w2_ref[...], preferred_element_type=jnp.float32)  # (TB*8, 256)

    p2 = jnp.maximum(c2[:, :128], c2[:, 128:])                       # (TB*8, 128)
    scr2[...] = p2
    h2 = jnp.maximum(scr2[pl.ds(0, tb * 4, 2), :],
                     scr2[pl.ds(1, tb * 4, 2), :])                   # (TB*4, 128)
    scrh2[...] = jnp.maximum(h2 + b2_ref[...], 0.0)                  # + bias, relu

    # ---- flatten (four 128-lane-aligned pieces) + fc1 + relu (Dropout == identity) ----
    flat = jnp.concatenate([scrh2[pl.ds(s, tb, 4), :] for s in range(4)], axis=-1)  # (TB, 512)
    z1 = jnp.dot(flat.astype(jnp.bfloat16), fc1w_ref[...],
                 preferred_element_type=jnp.float32) + fc1b_ref[...]
    z1 = jnp.maximum(z1, 0.0)                                        # (TB, 128)

    # ---- fc2 (50 -> 10), padded to 128 lanes for an unmasked lane-dense store ----
    out_ref[...] = jnp.dot(z1.astype(jnp.bfloat16), fc2w_ref[...],
                           preferred_element_type=jnp.float32) + fc2b_ref[...]


# ---------------------------------------------------------------------------
# Weight lowering (hoisted: call prepare_params ONCE and reuse the result)
# ---------------------------------------------------------------------------
def _conv1_weight(w1):
    """(10,1,5,5) -> (640,256) banded matrix; rows = ky*128 + input_col, cols parity-split."""
    col = jnp.arange(28)
    c = jnp.arange(24)
    kx = col[:, None] - c[None, :]                      # (28, 24)
    valid = ((kx >= 0) & (kx < 5)).astype(w1.dtype)
    kxc = jnp.clip(kx, 0, 4)
    w = w1[:, 0, :, :]                                  # (o, ky, kx)
    wk = w[:, :, kxc] * valid[None, None, :, :]         # (10, 5, 28, 24) [o, ky, col, c]
    wk = jnp.transpose(wk, (1, 2, 3, 0))                # (ky, col, c, o)
    wk_e = wk[:, :, 0::2, :].reshape(5, 28, 120)        # even output cols: lane = e*10 + o
    wk_o = wk[:, :, 1::2, :].reshape(5, 28, 120)        # odd output cols
    wk_e = jnp.pad(wk_e, ((0, 0), (0, 100), (0, 8)))    # rows 28->128, lanes 120->128
    wk_o = jnp.pad(wk_o, ((0, 0), (0, 100), (0, 8)))
    return jnp.concatenate([wk_e, wk_o], axis=-1).reshape(640, 256)


def _conv2_weight(w2):
    """(20,10,5,5) -> (640,256); rows = ky*128 + in_col*10 + cin, cols parity-split."""
    cc = jnp.arange(12)
    c = jnp.arange(8)
    kx = cc[:, None] - c[None, :]                       # (12, 8)
    valid = ((kx >= 0) & (kx < 5)).astype(w2.dtype)
    kxc = jnp.clip(kx, 0, 4)
    w = jnp.transpose(w2, (2, 3, 1, 0))                 # (ky, kx, i, o)
    wk = w[:, kxc, :, :]                                # (5, 12, 8, 10, 20) [ky, cc, c, i, o]
    wk = wk * valid[None, :, :, None, None]
    wk = jnp.transpose(wk, (0, 1, 3, 2, 4))             # (ky, cc, i, c, o)
    wk = wk.reshape(5, 120, 8, 20)                      # row lane = cc*10 + i
    wk_e = wk[:, :, 0::2, :].reshape(5, 120, 80)        # lane = e*20 + o
    wk_o = wk[:, :, 1::2, :].reshape(5, 120, 80)
    wk_e = jnp.pad(wk_e, ((0, 0), (0, 8), (0, 48)))
    wk_o = jnp.pad(wk_o, ((0, 0), (0, 8), (0, 48)))
    return jnp.concatenate([wk_e, wk_o], axis=-1).reshape(640, 256)


def _fc1_weight(fc1w):
    """(50,320) with PyTorch (C,H,W) flatten -> (512,128); rows = s*128 + w*20 + c."""
    w = fc1w.reshape(50, 20, 4, 4)                      # (u, o, s, e)
    w = jnp.transpose(w, (2, 3, 1, 0)).reshape(4, 80, 50)   # (s, e*20+o, u)
    w = jnp.pad(w, ((0, 0), (0, 48), (0, 78)))          # (4, 128, 128)
    return w.reshape(512, 128)


def prepare_params(params):
    """Lower PyTorch-layout params to matmul-ready kernel arrays (bf16 weights, f32 biases)."""
    w1, b1, w2, b2, fc1w, fc1b, fc2w, fc2b = [p.astype(jnp.float32) for p in params]
    w1_k = _conv1_weight(w1).astype(jnp.bfloat16)
    w2_k = _conv2_weight(w2).astype(jnp.bfloat16)
    fc1w_k = _fc1_weight(fc1w).astype(jnp.bfloat16)
    fc2w_k = jnp.pad(fc2w.T, ((0, 128 - 50), (0, 128 - 10))).astype(jnp.bfloat16)
    b1_k = jnp.pad(jnp.tile(b1, 12), (0, 8)).reshape(1, 128)
    b2_k = jnp.pad(jnp.tile(b2, 4), (0, 48)).reshape(1, 128)
    fc1b_k = jnp.pad(fc1b, (0, 78)).reshape(1, 128)
    fc2b_k = jnp.pad(fc2b, (0, 118)).reshape(1, 128)
    return (w1_k, b1_k, w2_k, b2_k, fc1w_k, fc1b_k, fc2w_k, fc2b_k)


# ---------------------------------------------------------------------------
# Forward wrapper
# ---------------------------------------------------------------------------
@functools.partial(jax.jit, static_argnames=("block_batch",))
def net_forward_prepared(x_nchw, kparams, block_batch=128):
    """x_nchw: (N, 1, 28, 28) float32; kparams from prepare_params. Returns (N, 10) logits."""
    w1_k, b1_k, w2_k, b2_k, fc1w_k, fc1b_k, fc2w_k, fc2b_k = kparams
    n = x_nchw.shape[0]

    n8 = _round_up(n, 8)
    tb = min(block_batch, n8)
    if tb == n8 and n8 >= 16:          # keep >= 2 grid steps so the parallel batch axis
        tb = _round_up(n8 // 2, 8)     # can be sharded across TensorCores (v7x) / megacore
    n_pad = _round_up(n, tb)

    x_k = x_nchw[:, 0, :, :].astype(jnp.float32)
    if n_pad != n:
        x_k = jnp.pad(x_k, ((0, n_pad - n), (0, 0), (0, 0)))

    grid = (n_pad // tb,)
    out = pl.pallas_call(
        _net_kernel,
        out_shape=jax.ShapeDtypeStruct((n_pad, 128), jnp.float32),
        grid=grid,
        in_specs=[
            pl.BlockSpec((tb, 28, 28), lambda b: (b, 0, 0)),
            pl.BlockSpec((640, 256), lambda b: (0, 0)),
            pl.BlockSpec((1, 128), lambda b: (0, 0)),
            pl.BlockSpec((640, 256), lambda b: (0, 0)),
            pl.BlockSpec((1, 128), lambda b: (0, 0)),
            pl.BlockSpec((512, 128), lambda b: (0, 0)),
            pl.BlockSpec((1, 128), lambda b: (0, 0)),
            pl.BlockSpec((128, 128), lambda b: (0, 0)),
            pl.BlockSpec((1, 128), lambda b: (0, 0)),
        ],
        out_specs=pl.BlockSpec((tb, 128), lambda b: (b, 0)),
        scratch_shapes=[
            pltpu.VMEM((tb, 24, 128), jnp.float32),   # conv1 col-pooled (for row pooling)
            pltpu.VMEM((tb, 12, 128), jnp.float32),   # h1 (for conv2 ky-window reads)
            pltpu.VMEM((tb * 8, 128), jnp.float32),   # conv2 col-pooled (for row pooling)
            pltpu.VMEM((tb * 4, 128), jnp.float32),   # h2 (for flatten strided reads)
        ],
        compiler_params=pltpu.CompilerParams(
            dimension_semantics=("parallel",),
            vmem_limit_bytes=48 * 1024 * 1024),
    )(x_k, w1_k, b1_k, w2_k, b2_k, fc1w_k, fc1b_k, fc2w_k, fc2b_k)

    return out[:n, :10]


def net_forward(x_nchw, params, block_batch=128):
    """Convenience wrapper; for repeated calls, hoist prepare_params() and reuse."""
    return net_forward_prepared(x_nchw, prepare_params(params), block_batch=block_batch)


# ---------------------------------------------------------------------------
# Reference / test harness
# ---------------------------------------------------------------------------
def init_params(key):
    """Deterministic params with PyTorch nn.Module shapes (uniform +/- 1/sqrt(fan_in))."""
    ks = jax.random.split(key, 8)

    def u(k, shape, fan_in):
        bound = 1.0 / (fan_in ** 0.5)
        return jax.random.uniform(k, shape, jnp.float32, -bound, bound)

    return (u(ks[0], (10, 1, 5, 5), 25), u(ks[1], (10,), 25),
            u(ks[2], (20, 10, 5, 5), 250), u(ks[3], (20,), 250),
            u(ks[4], (50, 320), 320), u(ks[5], (50,), 320),
            u(ks[6], (10, 50), 50), u(ks[7], (10,), 50))


def net_reference(x, params):
    """Plain-JAX f32 reference matching the PyTorch forward (eval mode)."""
    w1, b1, w2, b2, fc1w, fc1b, fc2w, fc2b = params
    dn = ("NCHW", "OIHW", "NCHW")
    y = lax.conv_general_dilated(x, w1, (1, 1), "VALID", dimension_numbers=dn)
    y = y + b1[None, :, None, None]
    y = lax.reduce_window(y, -jnp.inf, lax.max, (1, 1, 2, 2), (1, 1, 2, 2), "VALID")
    y = jnp.maximum(y, 0.0)
    y = lax.conv_general_dilated(y, w2, (1, 1), "VALID", dimension_numbers=dn)
    y = y + b2[None, :, None, None]
    y = lax.reduce_window(y, -jnp.inf, lax.max, (1, 1, 2, 2), (1, 1, 2, 2), "VALID")
    y = jnp.maximum(y, 0.0)
    y = y.reshape(-1, 320)
    y = jnp.maximum(y @ fc1w.T + fc1b, 0.0)
    return y @ fc2w.T + fc2b


if __name__ == "__main__":
    key = jax.random.PRNGKey(0)
    kx, kp = jax.random.split(key)
    # Net implies MNIST-sized input: (N, 1, 28, 28) so the flatten yields 320 features.
    x = jax.random.normal(kx, (2, 1, 28, 28), jnp.float32)
    params = init_params(kp)

    kparams = prepare_params(params)          # weight lowering hoisted out of the hot path
    out = net_forward_prepared(x, kparams)
    out = jax.block_until_ready(out)
    assert out.shape == (2, 10), out.shape

    ref = net_reference(x, params)
    # TODO(synk): Dropout / Dropout2d are eval-mode identities (no in-kernel RNG path).
    assert jnp.allclose(out, ref, atol=3e-2, rtol=3e-2), (out, ref)

    print("KERNEL_OK")
</pallas_src>

<mosaic_0001>
module attributes {stable_mosaic.version = 11 : i64} {
  func.func @_net_kernel(%arg0: i32, %arg1: memref<8x28x28xf32, #tpu.memory_space<vmem>>, %arg2: memref<640x256xbf16, #tpu.memory_space<vmem>>, %arg3: memref<1x128xf32, #tpu.memory_space<vmem>>, %arg4: memref<640x256xbf16, #tpu.memory_space<vmem>>, %arg5: memref<1x128xf32, #tpu.memory_space<vmem>>, %arg6: memref<512x128xbf16, #tpu.memory_space<vmem>>, %arg7: memref<1x128xf32, #tpu.memory_space<vmem>>, %arg8: memref<128x128xbf16, #tpu.memory_space<vmem>>, %arg9: memref<1x128xf32, #tpu.memory_space<vmem>>, %arg10: memref<8x128xf32, #tpu.memory_space<vmem>>, %arg11: memref<8x24x128xf32, #tpu.memory_space<vmem>>, %arg12: memref<8x12x128xf32, #tpu.memory_space<vmem>>, %arg13: memref<64x128xf32, #tpu.memory_space<vmem>>, %arg14: memref<32x128xf32, #tpu.memory_space<vmem>>) attributes {dimension_semantics = [#tpu.dimension_semantics<parallel>], iteration_bounds = array<i64: 1>, scalar_prefetch = 0 : i64, scratch_operands = 4 : i64, tpu.core_type = #tpu.core_type<tc>, window_params = [{transform_indices = @transform_0, window_bounds = array<i64: 8, 28, 28>}, {pipeline_mode = #tpu.pipeline_mode<synchronous>, transform_indices = @transform_1, window_bounds = array<i64: 640, 256>}, {pipeline_mode = #tpu.pipeline_mode<synchronous>, transform_indices = @transform_2, window_bounds = array<i64: 1, 128>}, {pipeline_mode = #tpu.pipeline_mode<synchronous>, transform_indices = @transform_3, window_bounds = array<i64: 640, 256>}, {pipeline_mode = #tpu.pipeline_mode<synchronous>, transform_indices = @transform_4, window_bounds = array<i64: 1, 128>}, {pipeline_mode = #tpu.pipeline_mode<synchronous>, transform_indices = @transform_5, window_bounds = array<i64: 512, 128>}, {pipeline_mode = #tpu.pipeline_mode<synchronous>, transform_indices = @transform_6, window_bounds = array<i64: 1, 128>}, {pipeline_mode = #tpu.pipeline_mode<synchronous>, transform_indices = @transform_7, window_bounds = array<i64: 128, 128>}, {pipeline_mode = #tpu.pipeline_mode<synchronous>, transform_indices = @transform_8, window_bounds = array<i64: 1, 128>}, {transform_indices = @transform_9, window_bounds = array<i64: 8, 128>}]} {
    %cst = arith.constant 0.000000e+00 : bf16
    %0 = vector.broadcast %cst : bf16 to vector<8x24x100xbf16>
    %c0 = arith.constant 0 : index
    %c0_0 = arith.constant 0 : index
    %c0_1 = arith.constant 0 : index
    %1 = vector.load %arg1[%c0, %c0_0, %c0_1] : memref<8x28x28xf32, #tpu.memory_space<vmem>>, vector<8x24x28xf32>
    %2 = arith.truncf %1 : vector<8x24x28xf32> to vector<8x24x28xbf16>
    %c0_2 = arith.constant 0 : index
    %c1 = arith.constant 1 : index
    %c0_3 = arith.constant 0 : index
    %3 = vector.load %arg1[%c0_2, %c1, %c0_3] : memref<8x28x28xf32, #tpu.memory_space<vmem>>, vector<8x24x28xf32>
    %4 = arith.truncf %3 : vector<8x24x28xf32> to vector<8x24x28xbf16>
    %c0_4 = arith.constant 0 : index
    %c2 = arith.constant 2 : index
    %c0_5 = arith.constant 0 : index
    %5 = vector.load %arg1[%c0_4, %c2, %c0_5] : memref<8x28x28xf32, #tpu.memory_space<vmem>>, vector<8x24x28xf32>
    %6 = arith.truncf %5 : vector<8x24x28xf32> to vector<8x24x28xbf16>
    %c0_6 = arith.constant 0 : index
    %c3 = arith.constant 3 : index
    %c0_7 = arith.constant 0 : index
    %7 = vector.load %arg1[%c0_6, %c3, %c0_7] : memref<8x28x28xf32, #tpu.memory_space<vmem>>, vector<8x24x28xf32>
    %8 = arith.truncf %7 : vector<8x24x28xf32> to vector<8x24x28xbf16>
    %c0_8 = arith.constant 0 : index
    %c4 = arith.constant 4 : index
    %c0_9 = arith.constant 0 : index
    %9 = vector.load %arg1[%c0_8, %c4, %c0_9] : memref<8x28x28xf32, #tpu.memory_space<vmem>>, vector<8x24x28xf32>
    %10 = arith.truncf %9 : vector<8x24x28xf32> to vector<8x24x28xbf16>
    %11 = tpu.concatenate %2, %0, %4, %0, %6, %0, %8, %0, %10, %0 in 2 : vector<8x24x28xbf16>, vector<8x24x100xbf16>, vector<8x24x28xbf16>, vector<8x24x100xbf16>, vector<8x24x28xbf16>, vector<8x24x100xbf16>, vector<8x24x28xbf16>, vector<8x24x100xbf16>, vector<8x24x28xbf16>, vector<8x24x100xbf16> -> vector<8x24x640xbf16>
    %12 = vector.shape_cast %11 : vector<8x24x640xbf16> to vector<192x640xbf16>
    %c0_10 = arith.constant 0 : index
    %c0_11 = arith.constant 0 : index
    %13 = vector.load %arg2[%c0_10, %c0_11] : memref<640x256xbf16, #tpu.memory_space<vmem>>, vector<640x256xbf16>
    %cst_12 = arith.constant dense<0.000000e+00> : vector<192x256xf32>
    %14 = tpu.matmul %12, %13, %cst_12 {dimension_numbers = #tpu.dot_dimension_numbers<[1], [0], [0], [1], [0, 0, 1, 1], [], []>} : vector<192x640xbf16>, vector<640x256xbf16>, vector<192x256xf32> -> vector<192x256xf32>
    %15 = vector.extract_strided_slice %14 {offsets = [0, 0], sizes = [192, 128], strides = [1, 1]} : vector<192x256xf32> to vector<192x128xf32>
    %16 = vector.extract_strided_slice %14 {offsets = [0, 128], sizes = [192, 128], strides = [1, 1]} : vector<192x256xf32> to vector<192x128xf32>
    %17 = arith.maximumf %15, %16 : vector<192x128xf32>
    %18 = vector.shape_cast %17 : vector<192x128xf32> to vector<8x24x128xf32>
    %c0_13 = arith.constant 0 : index
    %c0_14 = arith.constant 0 : index
    %c0_15 = arith.constant 0 : index
    %19 = vector.load %arg11[%c0_13, %c0_14, %c0_15] : memref<8x24x128xf32, #tpu.memory_space<vmem>>, vector<8x24x128xf32>
    tpu.vector_store %arg11[%c0_13, %c0_14, %c0_15], %18 {strides = array<i32>} : memref<8x24x128xf32, #tpu.memory_space<vmem>>, vector<8x24x128xf32>,
    %c0_16 = arith.constant 0 : index
    %c0_17 = arith.constant 0 : index
    %c0_18 = arith.constant 0 : index
    %20 = tpu.strided_load %arg11[%c0_16, %c0_17, %c0_18] {strides = array<i32: 1, 2, 1>} : memref<8x24x128xf32, #tpu.memory_space<vmem>>, vector<8x12x128xf32>
    %c0_19 = arith.constant 0 : index
    %c1_20 = arith.constant 1 : index
    %c0_21 = arith.constant 0 : index
    %21 = tpu.strided_load %arg11[%c0_19, %c1_20, %c0_21] {strides = array<i32: 1, 2, 1>} : memref<8x24x128xf32, #tpu.memory_space<vmem>>, vector<8x12x128xf32>
    %22 = arith.maximumf %20, %21 : vector<8x12x128xf32>
    %c0_22 = arith.constant 0 : index
    %c0_23 = arith.constant 0 : index
    %23 = vector.load %arg3[%c0_22, %c0_23] : memref<1x128xf32, #tpu.memory_space<vmem>>, vector<1x128xf32>
    %24 = vector.shape_cast %23 : vector<1x128xf32> to vector<1x1x128xf32>
    %25 = vector.broadcast %24 : vector<1x1x128xf32> to vector<8x12x128xf32>
    %26 = arith.addf %22, %25 : vector<8x12x128xf32>
    %cst_24 = arith.constant 0.000000e+00 : f32
    %27 = vector.broadcast %cst_24 : f32 to vector<8x12x128xf32>
    %28 = arith.maximumf %26, %27 : vector<8x12x128xf32>
    %c0_25 = arith.constant 0 : index
    %c0_26 = arith.constant 0 : index
    %c0_27 = arith.constant 0 : index
    %29 = vector.load %arg12[%c0_25, %c0_26, %c0_27] : memref<8x12x128xf32, #tpu.memory_space<vmem>>, vector<8x12x128xf32>
    tpu.vector_store %arg12[%c0_25, %c0_26, %c0_27], %28 {strides = array<i32>} : memref<8x12x128xf32, #tpu.memory_space<vmem>>, vector<8x12x128xf32>,
    %c0_28 = arith.constant 0 : index
    %c0_29 = arith.constant 0 : index
    %c0_30 = arith.constant 0 : index
    %30 = vector.load %arg12[%c0_28, %c0_29, %c0_30] : memref<8x12x128xf32, #tpu.memory_space<vmem>>, vector<8x8x128xf32>
    %c0_31 = arith.constant 0 : index
    %c1_32 = arith.constant 1 : index
    %c0_33 = arith.constant 0 : index
    %31 = vector.load %arg12[%c0_31, %c1_32, %c0_33] : memref<8x12x128xf32, #tpu.memory_space<vmem>>, vector<8x8x128xf32>
    %c0_34 = arith.constant 0 : index
    %c2_35 = arith.constant 2 : index
    %c0_36 = arith.constant 0 : index
    %32 = vector.load %arg12[%c0_34, %c2_35, %c0_36] : memref<8x12x128xf32, #tpu.memory_space<vmem>>, vector<8x8x128xf32>
    %c0_37 = arith.constant 0 : index
    %c3_38 = arith.constant 3 : index
    %c0_39 = arith.constant 0 : index
    %33 = vector.load %arg12[%c0_37, %c3_38, %c0_39] : memref<8x12x128xf32, #tpu.memory_space<vmem>>, vector<8x8x128xf32>
    %c0_40 = arith.constant 0 : index
    %c4_41 = arith.constant 4 : index
    %c0_42 = arith.constant 0 : index
    %34 = vector.load %arg12[%c0_40, %c4_41, %c0_42] : memref<8x12x128xf32, #tpu.memory_space<vmem>>, vector<8x8x128xf32>
    %35 = tpu.concatenate %30, %31, %32, %33, %34 in 2 : vector<8x8x128xf32>, vector<8x8x128xf32>, vector<8x8x128xf32>, vector<8x8x128xf32>, vector<8x8x128xf32> -> vector<8x8x640xf32>
    %36 = vector.shape_cast %35 : vector<8x8x640xf32> to vector<64x640xf32>
    %37 = arith.truncf %36 : vector<64x640xf32> to vector<64x640xbf16>
    %c0_43 = arith.constant 0 : index
    %c0_44 = arith.constant 0 : index
    %38 = vector.load %arg4[%c0_43, %c0_44] : memref<640x256xbf16, #tpu.memory_space<vmem>>, vector<640x256xbf16>
    %cst_45 = arith.constant dense<0.000000e+00> : vector<64x256xf32>
    %39 = tpu.matmul %37, %38, %cst_45 {dimension_numbers = #tpu.dot_dimension_numbers<[1], [0], [0], [1], [0, 0, 1, 1], [], []>} : vector<64x640xbf16>, vector<640x256xbf16>, vector<64x256xf32> -> vector<64x256xf32>
    %40 = vector.extract_strided_slice %39 {offsets = [0, 0], sizes = [64, 128], strides = [1, 1]} : vector<64x256xf32> to vector<64x128xf32>
    %41 = vector.extract_strided_slice %39 {offsets = [0, 128], sizes = [64, 128], strides = [1, 1]} : vector<64x256xf32> to vector<64x128xf32>
    %42 = arith.maximumf %40, %41 : vector<64x128xf32>
    %c0_46 = arith.constant 0 : index
    %c0_47 = arith.constant 0 : index
    %43 = vector.load %arg13[%c0_46, %c0_47] : memref<64x128xf32, #tpu.memory_space<vmem>>, vector<64x128xf32>
    tpu.vector_store %arg13[%c0_46, %c0_47], %42 {strides = array<i32>} : memref<64x128xf32, #tpu.memory_space<vmem>>, vector<64x128xf32>,
    %c0_48 = arith.constant 0 : index
    %c0_49 = arith.constant 0 : index
    %44 = tpu.strided_load %arg13[%c0_48, %c0_49] {strides = array<i32: 2, 1>} : memref<64x128xf32, #tpu.memory_space<vmem>>, vector<32x128xf32>
    %c1_50 = arith.constant 1 : index
    %c0_51 = arith.constant 0 : index
    %45 = tpu.strided_load %arg13[%c1_50, %c0_51] {strides = array<i32: 2, 1>} : memref<64x128xf32, #tpu.memory_space<vmem>>, vector<32x128xf32>
    %46 = arith.maximumf %44, %45 : vector<32x128xf32>
    %c0_52 = arith.constant 0 : index
    %c0_53 = arith.constant 0 : index
    %47 = vector.load %arg5[%c0_52, %c0_53] : memref<1x128xf32, #tpu.memory_space<vmem>>, vector<1x128xf32>
    %48 = vector.broadcast %47 : vector<1x128xf32> to vector<32x128xf32>
    %49 = arith.addf %46, %48 : vector<32x128xf32>
    %cst_54 = arith.constant 0.000000e+00 : f32
    %50 = vector.broadcast %cst_54 : f32 to vector<32x128xf32>
    %51 = arith.maximumf %49, %50 : vector<32x128xf32>
    %c0_55 = arith.constant 0 : index
    %c0_56 = arith.constant 0 : index
    %52 = vector.load %arg14[%c0_55, %c0_56] : memref<32x128xf32, #tpu.memory_space<vmem>>, vector<32x128xf32>
    tpu.vector_store %arg14[%c0_55, %c0_56], %51 {strides = array<i32>} : memref<32x128xf32, #tpu.memory_space<vmem>>, vector<32x128xf32>,
    %c0_57 = arith.constant 0 : index
    %c0_58 = arith.constant 0 : index
    %53 = tpu.strided_load %arg14[%c0_57, %c0_58] {strides = array<i32: 4, 1>} : memref<32x128xf32, #tpu.memory_space<vmem>>, vector<8x128xf32>
    %c1_59 = arith.constant 1 : index
    %c0_60 = arith.constant 0 : index
    %54 = tpu.strided_load %arg14[%c1_59, %c0_60] {strides = array<i32: 4, 1>} : memref<32x128xf32, #tpu.memory_space<vmem>>, vector<8x128xf32>
    %c2_61 = arith.constant 2 : index
    %c0_62 = arith.constant 0 : index
    %55 = tpu.strided_load %arg14[%c2_61, %c0_62] {strides = array<i32: 4, 1>} : memref<32x128xf32, #tpu.memory_space<vmem>>, vector<8x128xf32>
    %c3_63 = arith.constant 3 : index
    %c0_64 = arith.constant 0 : index
    %56 = tpu.strided_load %arg14[%c3_63, %c0_64] {strides = array<i32: 4, 1>} : memref<32x128xf32, #tpu.memory_space<vmem>>, vector<8x128xf32>
    %57 = tpu.concatenate %53, %54, %55, %56 in 1 : vector<8x128xf32>, vector<8x128xf32>, vector<8x128xf32>, vector<8x128xf32> -> vector<8x512xf32>
    %58 = arith.truncf %57 : vector<8x512xf32> to vector<8x512xbf16>
    %c0_65 = arith.constant 0 : index
    %c0_66 = arith.constant 0 : index
    %59 = vector.load %arg6[%c0_65, %c0_66] : memref<512x128xbf16, #tpu.memory_space<vmem>>, vector<512x128xbf16>
    %cst_67 = arith.constant dense<0.000000e+00> : vector<8x128xf32>
    %60 = tpu.matmul %58, %59, %cst_67 {dimension_numbers = #tpu.dot_dimension_numbers<[1], [0], [0], [1], [0, 0, 1, 1], [], []>} : vector<8x512xbf16>, vector<512x128xbf16>, vector<8x128xf32> -> vector<8x128xf32>
    %c0_68 = arith.constant 0 : index
    %c0_69 = arith.constant 0 : index
    %61 = vector.load %arg7[%c0_68, %c0_69] : memref<1x128xf32, #tpu.memory_space<vmem>>, vector<1x128xf32>
    %62 = vector.broadcast %61 : vector<1x128xf32> to vector<8x128xf32>
    %63 = arith.addf %60, %62 : vector<8x128xf32>
    %cst_70 = arith.constant 0.000000e+00 : f32
    %64 = vector.broadcast %cst_70 : f32 to vector<8x128xf32>
    %65 = arith.maximumf %63, %64 : vector<8x128xf32>
    %66 = arith.truncf %65 : vector<8x128xf32> to vector<8x128xbf16>
    %c0_71 = arith.constant 0 : index
    %c0_72 = arith.constant 0 : index
    %67 = vector.load %arg8[%c0_71, %c0_72] : memref<128x128xbf16, #tpu.memory_space<vmem>>, vector<128x128xbf16>
    %cst_73 = arith.constant dense<0.000000e+00> : vector<8x128xf32>
    %68 = tpu.matmul %66, %67, %cst_73 {dimension_numbers = #tpu.dot_dimension_numbers<[1], [0], [0], [1], [0, 0, 1, 1], [], []>} : vector<8x128xbf16>, vector<128x128xbf16>, vector<8x128xf32> -> vector<8x128xf32>
    %c0_74 = arith.constant 0 : index
    %c0_75 = arith.constant 0 : index
    %69 = vector.load %arg9[%c0_74, %c0_75] : memref<1x128xf32, #tpu.memory_space<vmem>>, vector<1x128xf32>
    %70 = vector.broadcast %69 : vector<1x128xf32> to vector<8x128xf32>
    %71 = arith.addf %68, %70 : vector<8x128xf32>
    %c0_76 = arith.constant 0 : index
    %c0_77 = arith.constant 0 : index
    %72 = vector.load %arg10[%c0_76, %c0_77] : memref<8x128xf32, #tpu.memory_space<vmem>>, vector<8x128xf32>
    tpu.vector_store %arg10[%c0_76, %c0_77], %71 {strides = array<i32>} : memref<8x128xf32, #tpu.memory_space<vmem>>, vector<8x128xf32>,
    return
  }
  func.func @transform_0(%arg0: i32) -> (i32, i32, i32) {
    %c0_i32 = arith.constant 0 : i32
    %c0_i32_0 = arith.constant 0 : i32
    %c0_i32_1 = arith.constant 0 : i32
    return %arg0, %c0_i32, %c0_i32_0 : i32, i32, i32
  }
  func.func @transform_1(%arg0: i32) -> (i32, i32) {
    %c0_i32 = arith.constant 0 : i32
    %c0_i32_0 = arith.constant 0 : i32
    %c0_i32_1 = arith.constant 0 : i32
    return %c0_i32, %c0_i32_0 : i32, i32
  }
  func.func @transform_2(%arg0: i32) -> (i32, i32) {
    %c0_i32 = arith.constant 0 : i32
    %c0_i32_0 = arith.constant 0 : i32
    %c0_i32_1 = arith.constant 0 : i32
    return %c0_i32, %c0_i32_0 : i32, i32
  }
  func.func @transform_3(%arg0: i32) -> (i32, i32) {
    %c0_i32 = arith.constant 0 : i32
    %c0_i32_0 = arith.constant 0 : i32
    %c0_i32_1 = arith.constant 0 : i32
    return %c0_i32, %c0_i32_0 : i32, i32
  }
  func.func @transform_4(%arg0: i32) -> (i32, i32) {
    %c0_i32 = arith.constant 0 : i32
    %c0_i32_0 = arith.constant 0 : i32
    %c0_i32_1 = arith.constant 0 : i32
    return %c0_i32, %c0_i32_0 : i32, i32
  }
  func.func @transform_5(%arg0: i32) -> (i32, i32) {
    %c0_i32 = arith.constant 0 : i32
    %c0_i32_0 = arith.constant 0 : i32
    %c0_i32_1 = arith.constant 0 : i32
    return %c0_i32, %c0_i32_0 : i32, i32
  }
  func.func @transform_6(%arg0: i32) -> (i32, i32) {
    %c0_i32 = arith.constant 0 : i32
    %c0_i32_0 = arith.constant 0 : i32
    %c0_i32_1 = arith.constant 0 : i32
    return %c0_i32, %c0_i32_0 : i32, i32
  }
  func.func @transform_7(%arg0: i32) -> (i32, i32) {
    %c0_i32 = arith.constant 0 : i32
    %c0_i32_0 = arith.constant 0 : i32
    %c0_i32_1 = arith.constant 0 : i32
    return %c0_i32, %c0_i32_0 : i32, i32
  }
  func.func @transform_8(%arg0: i32) -> (i32, i32) {
    %c0_i32 = arith.constant 0 : i32
    %c0_i32_0 = arith.constant 0 : i32
    %c0_i32_1 = arith.constant 0 : i32
    return %c0_i32, %c0_i32_0 : i32, i32
  }
  func.func @transform_9(%arg0: i32) -> (i32, i32) {
    %c0_i32 = arith.constant 0 : i32
    %c0_i32_0 = arith.constant 0 : i32
    return %arg0, %c0_i32 : i32, i32
  }
}

</mosaic_0001>

<bundles_post_ra>
// kernel: net_forward_prepared.1
= control target key start
LH: loop header
LB: loop body
LE: loop exit
PB: predicated region body
PF: predicated region fallthrough
CT: control target
= control target key end

     0   :  { %14 = vsyncpa [#allocation7], 0  ;;  %s4810_s0 = inlined_call_operand.vmem [shape: f32[8,28,28], index: 0, kind: input, shape index: {}]   ;;  %s4811_s1 = inlined_call_operand.hbm [shape: bf16[640,256], index: 1, kind: input, shape index: {}]   ;;  %s4812_s2 = inlined_call_operand.vmem [shape: f32[1,128], index: 2, kind: input, shape index: {}]   ;;  %s4813_s3 = inlined_call_operand.hbm [shape: bf16[640,256], index: 3, kind: input, shape index: {}]   ;;  %s4814_s4 = inlined_call_operand.vmem [shape: f32[1,128], index: 4, kind: input, shape index: {}]   ;;  %s4815_s5 = inlined_call_operand.vmem [shape: bf16[512,128], index: 5, kind: input, shape index: {}]   ;;  %s4816_s6 = inlined_call_operand.vmem [shape: f32[1,128], index: 6, kind: input, shape index: {}]   ;;  %s4817_s7 = inlined_call_operand.vmem [shape: bf16[128,128], index: 7, kind: input, shape index: {}]   ;;  %s4818_s8 = inlined_call_operand.vmem [shape: f32[1,128], index: 8, kind: input, shape index: {}]   ;;  %s4819_s9 = inlined_call_operand.vmem [shape: f32[8,128], index: 9, kind: output, shape index: {}]  }
   0x1   :  { %15 = vsyncpa [#allocation9], 0  ;;  %s3799_s30 = smov [#allocation6]  }
   0x2   :  { %s23_s10 = sshll.u32 %s3799_s30, 4  ;;  %s24_s10 = int_to_ptr.vmem [resolvable:$true] %s23_s10 }
   0x3   :  { %s3763_s11 = scalar_lea.vmem %s24_s10, 10240  ;;  %p3768_p1 = scmp.lt.s32.totalorder %s24_s10, %s24_s10 }
   0x4   :  { %p3764_p0 = scmp.ne.s32.totalorder %s24_s10, %s3763_s11  ;;  %p3769_p2 = scmp.lt.s32.totalorder %s3763_s11, %s3763_s11 }
   0x6   :  { %p3770_p3 = por %p3769_p2, %p3768_p1 }
   0x8   :  { %p3771_p4 = pnand %p3770_p3, %p3764_p0 }
   0xa   :  { %3774 = shalt.err (!%p3771_p4)
}
   0xb   :  { %s3800_s12 = smov 128   ;;  %s3801_s13 = smov 8  }
   0xc   :  { %29 = dma.hbm_to_vmem [thread:$0]  %s4811_s1, 10240, %s24_s10, [#allocation7], %s3800_s12, %s3800_s12, %s3801_s13  }
   0xd   :  { %s3802_s16 = smov [#allocation8]  }
   0xe   :  { %s37_s17 = sshll.u32 %s3802_s16, 4  ;;  %s38_s17 = int_to_ptr.vmem [resolvable:$true] %s37_s17 }
   0xf   :  { %s3783_s18 = scalar_lea.vmem %s38_s17, 10240  ;;  %p3788_p6 = scmp.lt.s32.totalorder %s38_s17, %s38_s17 }
  0x10   :  { %p3784_p5 = scmp.ne.s32.totalorder %s38_s17, %s3783_s18  ;;  %p3789_p7 = scmp.lt.s32.totalorder %s3783_s18, %s3783_s18 }
  0x12   :  { %p3790_p8 = por %p3789_p7, %p3788_p6 }
  0x14   :  { %p3791_p9 = pnand %p3790_p8, %p3784_p5 }
  0x16   :  { %3794 = shalt.err (!%p3791_p9)
}
  0x17   :  { %43 = dma.hbm_to_vmem [thread:$0]  %s4813_s3, 10240, %s38_s17, [#allocation9], %s3800_s12, %s3800_s12, %s3801_s13  }
  0x18   :  { %3795 = dma.done.wait [#allocation7], 10240  }
  0x19   :  { %3796 = vsyncadd [#allocation7], 4294957056 }
  0x1a   :  { %3797 = dma.done.wait [#allocation9], 10240  }
  0x1b   :  { %3798 = vsyncadd [#allocation9], 4294957056  ;;  %v3475_v0 = vld [vmem:[#allocation6 + $0x74] ss:$8 sps:$4 sm:$0xff]   ;;  %v3479_v2 = vld [vmem:[#allocation6 + $0x70] ss:$8 sps:$4 sm:$0xff]  }
  0x1c   :  { %v3477_v1 = vld [vmem:[#allocation6 + $0x174] ss:$8 sps:$4 sm:$0xff]   ;;  %1223 = vmatprep.subr.bf16.mxu0 %v3475_v0  ;;  %v3480_v3 = vld [vmem:[#allocation6 + $0x170] ss:$8 sps:$4 sm:$0xff]   ;;  %v3481_v4 = vld [vmem:[#allocation6 + $0x64] ss:$8 sps:$4 sm:$0xff]  }
  0x1d   :  { %1376 = vmatprep.subr.bf16.mxu1 %v3477_v1  ;;  %1224 = vmatpush1.bf16.msra.mxu0 %v3479_v2  ;;  %v3483_v5 = vld [vmem:[#allocation6 + $0x164] ss:$8 sps:$4 sm:$0xff]   ;;  %v3485_v6 = vld [vmem:[#allocation6 + $0x60] ss:$8 sps:$4 sm:$0xff]   ;;  %v3487_v8 = vld [vmem:[#allocation6 + $0x54] ss:$8 sps:$4 sm:$0xff]  }
  0x1e   :  { %1377 = vmatpush1.bf16.msra.mxu1 %v3480_v3  ;;  %1225 = vmatprep.subr.bf16.mxu0 %v3481_v4  ;;  %v3486_v7 = vld [vmem:[#allocation6 + $0x160] ss:$8 sps:$4 sm:$0xff]   ;;  %v3489_v9 = vld [vmem:[#allocation6 + $0x154] ss:$8 sps:$4 sm:$0xff]   ;;  %v3491_v10 = vld [vmem:[#allocation6 + $0x50] ss:$8 sps:$4 sm:$0xff]  }
  0x1f   :  { %1378 = vmatprep.subr.bf16.mxu1 %v3483_v5  ;;  %v3492_v11 = vld [vmem:[#allocation6 + $0x150] ss:$8 sps:$4 sm:$0xff]   ;;  %v3493_v12 = vld [vmem:[#allocation6 + $0x44] ss:$8 sps:$4 sm:$0xff]   ;;  %v3497_v14 = vld [vmem:[#allocation6 + $0x40] ss:$8 sps:$4 sm:$0xff]  }
  0x20   :  { %v3495_v13 = vld [vmem:[#allocation6 + $0x144] ss:$8 sps:$4 sm:$0xff]   ;;  %v3498_v15 = vld [vmem:[#allocation6 + $0x140] ss:$8 sps:$4 sm:$0xff]   ;;  %v3499_v16 = vld [vmem:[#allocation6 + $0x34] ss:$8 sps:$4 sm:$0xff]  }
  0x21   :  { %1226 = vmatpush1.bf16.msra.mxu0 %v3485_v6  ;;  %v3501_v17 = vld [vmem:[#allocation6 + $0x134] ss:$8 sps:$4 sm:$0xff]   ;;  %v3503_v18 = vld [vmem:[#allocation6 + $0x30] ss:$8 sps:$4 sm:$0xff]   ;;  %v3505_v20 = vld [vmem:[#allocation6 + $0x24] ss:$8 sps:$4 sm:$0xff]  }
  0x22   :  { %1379 = vmatpush1.bf16.msra.mxu1 %v3486_v7  ;;  %1227 = vmatprep.subr.bf16.mxu0 %v3487_v8  ;;  %v3504_v19 = vld [vmem:[#allocation6 + $0x130] ss:$8 sps:$4 sm:$0xff]   ;;  %v3507_v21 = vld [vmem:[#allocation6 + $0x124] ss:$8 sps:$4 sm:$0xff]   ;;  %v3509_v22 = vld [vmem:[#allocation6 + $0x20] ss:$8 sps:$4 sm:$0xff]  }
  0x23   :  { %1380 = vmatprep.subr.bf16.mxu1 %v3489_v9  ;;  %v3510_v23 = vld [vmem:[#allocation6 + $0x120] ss:$8 sps:$4 sm:$0xff]   ;;  %v3511_v24 = vld [vmem:[#allocation6 + $0x14] ss:$8 sps:$4 sm:$0xff]   ;;  %v3515_v26 = vld [vmem:[#allocation6 + $0x10] ss:$8 sps:$4 sm:$0xff]  }
  0x24   :  { %v3513_v25 = vld [vmem:[#allocation6 + $0x114] ss:$8 sps:$4 sm:$0xff]   ;;  %v3516_v27 = vld [vmem:[#allocation6 + $0x110] ss:$8 sps:$4 sm:$0xff]   ;;  %v3517_v28 = vld [vmem:[#allocation6 + $0x4] ss:$8 sps:$4 sm:$0xff]  }
  0x25   :  { %1228 = vmatpush1.bf16.msra.mxu0 %v3491_v10  ;;  %v3519_v29 = vld [vmem:[#allocation6 + $0x104] ss:$8 sps:$4 sm:$0xff]   ;;  %v3521_v30 = vld [vmem:[#allocation6] ss:$8 sps:$4 sm:$0xff]   ;;  %v3523_v32 = vld [vmem:[#allocation6 + $0xf4] ss:$8 sps:$4 sm:$0xff]  }
  0x26   :  { %1381 = vmatpush1.bf16.msra.mxu1 %v3492_v11  ;;  %1229 = vmatprep.subr.bf16.mxu0 %v3493_v12  ;;  %v3522_v31 = vld [vmem:[#allocation6 + $0x100] ss:$8 sps:$4 sm:$0xff]   ;;  %v3525_v33 = vld [vmem:[#allocation6 + $0x1f4] ss:$8 sps:$4 sm:$0xff]   ;;  %v3527_v34 = vld [vmem:[#allocation6 + $0xf0] ss:$8 sps:$4 sm:$0xff]  }
  0x27   :  { %1382 = vmatprep.subr.bf16.mxu1 %v3495_v13  ;;  %v3528_v35 = vld [vmem:[#allocation6 + $0x1f0] ss:$8 sps:$4 sm:$0xff]   ;;  %v3529_v36 = vld [vmem:[#allocation6 + $0xe4] ss:$8 sps:$4 sm:$0xff]   ;;  %v3533_v38 = vld [vmem:[#allocation6 + $0xe0] ss:$8 sps:$4 sm:$0xff]  }
  0x28   :  { %v3531_v37 = vld [vmem:[#allocation6 + $0x1e4] ss:$8 sps:$4 sm:$0xff]   ;;  %v3534_v39 = vld [vmem:[#allocation6 + $0x1e0] ss:$8 sps:$4 sm:$0xff]   ;;  %v3535_v40 = vld [vmem:[#allocation6 + $0xd4] ss:$8 sps:$4 sm:$0xff]  }
  0x29   :  { %1230 = vmatpush1.bf16.msra.mxu0 %v3497_v14  ;;  %v3537_v41 = vld [vmem:[#allocation6 + $0x1d4] ss:$8 sps:$4 sm:$0xff]   ;;  %v3539_v42 = vld [vmem:[#allocation6 + $0xd0] ss:$8 sps:$4 sm:$0xff]   ;;  %v3541_v44 = vld [vmem:[#allocation6 + $0xc4] ss:$8 sps:$4 sm:$0xff]  }
  0x2a   :  { %1383 = vmatpush1.bf16.msra.mxu1 %v3498_v15  ;;  %1231 = vmatprep.subr.bf16.mxu0 %v3499_v16  ;;  %v3540_v43 = vld [vmem:[#allocation6 + $0x1d0] ss:$8 sps:$4 sm:$0xff]   ;;  %v3543_v45 = vld [vmem:[#allocation6 + $0x1c4] ss:$8 sps:$4 sm:$0xff]   ;;  %vm261_vm0 = vcmask 228352   ;;  %vm3805_vm1 = vmmov 0  }
  0x2b   :  { %1384 = vmatprep.subr.bf16.mxu1 %v3501_v17  ;;  %v101_v46 = vld [vmem:[%s4810_s0 + $0x1] sm:$0xff]  ;;  %v102_v47 = vld [vmem:[%s4810_s0 + $0x9] sm:$0xff]  ;;  %v3547_v52 = vld [vmem:[#allocation6 + $0xb4] ss:$8 sps:$4 sm:$0xff]  }
  0x2c   :  { %v181_v48 = vld [vmem:[%s4810_s0 + $0x3] sm:$0xff]  ;;  %v182_v49 = vld [vmem:[%s4810_s0 + $0xb] sm:$0xff]  ;;  %v125_v53 = vpack.c.bf16 %v102_v47, %v101_v46  ;;  %v3549_v55 = vld [vmem:[#allocation6 + $0x1b4] ss:$8 sps:$4 sm:$0xff]  }
  0x2d   :  { %1232 = vmatpush1.bf16.msra.mxu0 %v3503_v18  ;;  %v3545_v50 = vld [vmem:[#allocation6 + $0xc0] ss:$8 sps:$4 sm:$0xff]   ;;  %v205_v54 = vpack.c.bf16 %v182_v49, %v181_v48  ;;  %v3551_v56 = vld [vmem:[#allocation6 + $0xb0] ss:$8 sps:$4 sm:$0xff]   ;;  %v3553_v58 = vld [vmem:[#allocation6 + $0xa4] ss:$8 sps:$4 sm:$0xff]  }
  0x2e   :  { %1385 = vmatpush1.bf16.msra.mxu1 %v3504_v19  ;;  %1233 = vmatprep.subr.bf16.mxu0 %v3505_v20  ;;  %v3546_v51 = vld [vmem:[#allocation6 + $0x1c0] ss:$8 sps:$4 sm:$0xff]   ;;  %v3552_v57 = vld [vmem:[#allocation6 + $0x1b0] ss:$8 sps:$4 sm:$0xff]   ;;  %v3555_v59 = vld [vmem:[#allocation6 + $0x1a4] ss:$8 sps:$4 sm:$0xff]  }
  0x2f   :  { %1386 = vmatprep.subr.bf16.mxu1 %v3507_v21  ;;  %3251 = vmatprep.mubr.msk.bf16.mxu0 %vm261_vm0, %v125_v53  ;;  %v3557_v60 = vld [vmem:[#allocation6 + $0xa0] ss:$8 sps:$4 sm:$0xff]   ;;  %v3559_v62 = vld [vmem:[#allocation6 + $0x94] ss:$8 sps:$4 sm:$0xff]   ;;  %v3563_v0 = vld [vmem:[#allocation6 + $0x90] ss:$8 sps:$4 sm:$0xff]  }
  0x30   :  { %3259 = vmatprep.mubr.msk.bf16.mxu1 %vm261_vm0, %v205_v54  ;;  %v3558_v61 = vld [vmem:[#allocation6 + $0x1a0] ss:$8 sps:$4 sm:$0xff]   ;;  %v3561_v63 = vld [vmem:[#allocation6 + $0x194] ss:$8 sps:$4 sm:$0xff]   ;;  %v3564_v7 = vld [vmem:[#allocation6 + $0x190] ss:$8 sps:$4 sm:$0xff]  }
  0x31   :  { %1234 = vmatpush1.bf16.msra.mxu0 %v3509_v22  ;;  %v103_v1 = vld [vmem:[%s4810_s0 + $0x11] sm:$0xff]  ;;  %v104_v2 = vld [vmem:[%s4810_s0 + $0x21] sm:$0xff]  ;;  %v105_v3 = vld [vmem:[%s4810_s0 + $0x29] sm:$0xff] }
  0x32   :  { %1387 = vmatpush1.bf16.msra.mxu1 %v3510_v23  ;;  %1235 = vmatprep.subr.bf16.mxu0 %v3511_v24  ;;  %v183_v4 = vld [vmem:[%s4810_s0 + $0x13] sm:$0xff]  ;;  %v184_v5 = vld [vmem:[%s4810_s0 + $0x23] sm:$0xff]  ;;  %v185_v6 = vld [vmem:[%s4810_s0 + $0x2b] sm:$0xff]  ;;  %v126_v10 = vpack.c.bf16 %v103_v1, %v103_v1  ;;  %v127_v11 = vpack.c.bf16 %v105_v3, %v104_v2 }
  0x33   :  { %1388 = vmatprep.subr.bf16.mxu1 %v3513_v25  ;;  %v3565_v8 = vld [vmem:[#allocation6 + $0x84] ss:$8 sps:$4 sm:$0xff]   ;;  %v3569_v12 = vld [vmem:[#allocation6 + $0x80] ss:$8 sps:$4 sm:$0xff]   ;;  %v206_v18 = vpack.c.bf16 %v183_v4, %v183_v4  ;;  %v207_v19 = vpack.c.bf16 %v185_v6, %v184_v5  ;;  %v106_v20 = vld [vmem:[%s4810_s0 + $0x31] sm:$0xff] }
  0x34   :  { %v3567_v9 = vld [vmem:[#allocation6 + $0x184] ss:$8 sps:$4 sm:$0xff]   ;;  %v3570_v13 = vld [vmem:[#allocation6 + $0x180] ss:$8 sps:$4 sm:$0xff]   ;;  %v186_v21 = vld [vmem:[%s4810_s0 + $0x33] sm:$0xff] }
  0x35   :  { %1236 = vmatpush1.bf16.msra.mxu0 %v3515_v26  ;;  %v61_v14 = vld [vmem:[%s4810_s0] sm:$0xff]  ;;  %v62_v15 = vld [vmem:[%s4810_s0 + $0x8] sm:$0xff]  ;;  %v63_v22 = vld [vmem:[%s4810_s0 + $0x10] sm:$0xff] }
  0x36   :  { %1389 = vmatpush1.bf16.msra.mxu1 %v3516_v27  ;;  %1237 = vmatprep.subr.bf16.mxu0 %v3517_v28  ;;  %v141_v16 = vld [vmem:[%s4810_s0 + $0x2] sm:$0xff]  ;;  %v142_v17 = vld [vmem:[%s4810_s0 + $0xa] sm:$0xff]  ;;  %v143_v25 = vld [vmem:[%s4810_s0 + $0x12] sm:$0xff] }
  0x37   :  { %1390 = vmatprep.subr.bf16.mxu1 %v3519_v29  ;;  %v64_v23 = vld [vmem:[%s4810_s0 + $0x20] sm:$0xff]  ;;  %v65_v24 = vld [vmem:[%s4810_s0 + $0x28] sm:$0xff]  ;;  %v3573_v28 = vld [vmem:[#allocation6 + $0x274] ss:$8 sps:$4 sm:$0xff]   ;;  %v298_v29 = vsel %vm261_vm0, %v126_v10, 0 }
  0x38   :  { %v144_v26 = vld [vmem:[%s4810_s0 + $0x22] sm:$0xff]  ;;  %v145_v27 = vld [vmem:[%s4810_s0 + $0x2a] sm:$0xff]  ;;  %v146_v48 = vld [vmem:[%s4810_s0 + $0x32] sm:$0xff] }
  0x39   :  { %1238 = vmatpush1.bf16.msra.mxu0 %v3521_v30  ;;  %v300_v30 = vsel %vm261_vm0, %v127_v11, 0  ;;  %v66_v47 = vld [vmem:[%s4810_s0 + $0x30] sm:$0xff]  ;;  %v3582_v4 = vld [vmem:[#allocation6 + $0x244] ss:$8 sps:$4 sm:$0xff]  }
  0x3a   :  { %1391 = vmatpush1.bf16.msra.mxu1 %v3522_v31  ;;  %1239 = vmatprep.subr.bf16.mxu0 %v3523_v32  ;;  %v128_v31 = vpack.c.bf16 %v106_v20, %v106_v20  ;;  %v208_v32 = vpack.c.bf16 %v186_v21, %v186_v21  ;;  %v524_v53 = vunpack.c.h.b16 %v300_v30  ;;  %v3577_v3 = vld [vmem:[#allocation6 + $0x250] ss:$8 sps:$4 sm:$0xff]   ;;  %v187_v11 = vld [vmem:[%s4810_s0 + $0x43] sm:$0xff]  ;;  %v3585_v20 = vld [vmem:[#allocation6 + $0x234] ss:$8 sps:$4 sm:$0xff]  }
  0x3b   :  { %1392 = vmatprep.subr.bf16.mxu1 %v3525_v33  ;;  %v362_v33 = vsel %vm261_vm0, %v206_v18, 0  ;;  %v108_v10 = vld [vmem:[%s4810_s0 + $0x49] sm:$0xff] }
  0x3c   :  { %v366_v46 = vsel %vm261_vm0, %v208_v32, 0  ;;  %v191_v18 = vld [vmem:[%s4810_s0 + $0x6b] sm:$0xff]  ;;  %v67_v32 = vld [vmem:[%s4810_s0 + $0x40] sm:$0xff] }
  0x3d   :  { %1240 = vmatpush2.bf16.msra.mxu0 %v3527_v34  ;;  %v364_v34 = vsel %vm261_vm0, %v207_v19, 0  ;;  %v3580_v19 = vld [vmem:[#allocation6 + $0x240] ss:$8 sps:$4 sm:$0xff]  }
  0x3e   :  { %1393 = vmatpush2.bf16.msra.mxu1 %v3528_v35  ;;  %1241 = vmatprep.subr.bf16.mxu0 %v3529_v36  ;;  %v86_v35 = vpack.c.bf16 %v63_v22, %v63_v22  ;;  %v87_v36 = vpack.c.bf16 %v65_v24, %v64_v23  ;;  %v526_v54 = vunpack.c.h.b16 %v364_v34 }
  0x3f   :  { %1394 = vmatprep.subr.bf16.mxu1 %v3531_v37  ;;  %v85_v37 = vpack.c.bf16 %v62_v15, %v61_v14  ;;  %v110_v14 = vld [vmem:[%s4810_s0 + $0x61] sm:$0xff]  ;;  %v111_v15 = vld [vmem:[%s4810_s0 + $0x69] sm:$0xff] }
  0x40   :  { %v266_v49 = vsel %vm261_vm0, %v86_v35, 0  ;;  %v148_v35 = vld [vmem:[%s4810_s0 + $0x4a] sm:$0xff] }
  0x41   :  { %1242 = vmatpush2.bf16.msra.mxu0 %v3533_v38  ;;  %v165_v38 = vpack.c.bf16 %v142_v17, %v141_v16  ;;  %v189_v16 = vld [vmem:[%s4810_s0 + $0x53] sm:$0xff]  ;;  %v190_v17 = vld [vmem:[%s4810_s0 + $0x63] sm:$0xff] }
  0x42   :  { %1395 = vmatpush2.bf16.msra.mxu1 %v3534_v39  ;;  %1243 = vmatprep.subr.bf16.mxu0 %v3535_v40  ;;  %v166_v39 = vpack.c.bf16 %v143_v25, %v143_v25  ;;  %v167_v40 = vpack.c.bf16 %v145_v27, %v144_v26  ;;  %v131_v26 = vpack.c.bf16 %v111_v15, %v110_v14 }
  0x43   :  { %1396 = vmatprep.subr.bf16.mxu1 %v3537_v41  ;;  %v3571_v41 = vld [vmem:[#allocation6 + $0x270] ss:$8 sps:$4 sm:$0xff]   ;;  %v210_v27 = vpack.c.bf16 %v189_v16, %v189_v16 }
  0x45   :  { %1244 = vmatpush2.bf16.msra.mxu0 %v3539_v42  ;;  %v3152_v42 = vcombine.low %v298_v29, %v300_v30  ;;  %v69_v29 = vld [vmem:[%s4810_s0 + $0x50] sm:$0xff]  ;;  %v70_v30 = vld [vmem:[%s4810_s0 + $0x60] sm:$0xff] }
  0x46   :  { %1397 = vmatpush2.bf16.msra.mxu1 %v3540_v43  ;;  %1245 = vmatprep.subr.bf16.mxu0 %v3541_v44  ;;  %v3154_v43 = vcombine.low %v362_v33, %v364_v34  ;;  %v3576_v44 = vld [vmem:[#allocation6 + $0x264] ss:$8 sps:$4 sm:$0xff]  }
  0x47   :  { %1398 = vmatprep.subr.bf16.mxu1 %v3543_v45  ;;  %v302_v45 = vsel %vm261_vm0, %v128_v31, 0  ;;  %v3583_v31 = vld [vmem:[#allocation6 + $0x230] ss:$8 sps:$4 sm:$0xff]   ;;  %v68_v33 = vld [vmem:[%s4810_s0 + $0x48] sm:$0xff] }
  0x48   :  { %v147_v34 = vld [vmem:[%s4810_s0 + $0x42] sm:$0xff] }
  0x49   :  { %1246 = vmatpush2.bf16.msra.mxu0 %v3545_v50  ;;  %v268_v50 = vsel %vm261_vm0, %v87_v36, 0  ;;  %v112_v36 = vld [vmem:[%s4810_s0 + $0x71] sm:$0xff] }
  0x4a   :  { %1399 = vmatpush2.bf16.msra.mxu1 %v3546_v51  ;;  %1247 = vmatprep.subr.bf16.mxu0 %v3547_v52  ;;  %v330_v51 = vsel %vm261_vm0, %v166_v39, 0  ;;  %v332_v52 = vsel %vm261_vm0, %v167_v40, 0  ;;  %v523_v5 = vunpack.c.h.b16 %v268_v50  ;;  %v71_v39 = vld [vmem:[%s4810_s0 + $0x68] sm:$0xff] }
  0x4b   :  { %1400 = vmatprep.subr.bf16.mxu1 %v3549_v55  ;;  %v3574_v55 = vld [vmem:[#allocation6 + $0x260] ss:$8 sps:$4 sm:$0xff]  }
  0x4d   :  { %1248 = vmatpush2.bf16.msra.mxu0 %v3551_v56  ;;  %v529_v56 = vunpack.c.l.b16 %v302_v45  ;;  %v370_v45 = vsel %vm261_vm0, %v210_v27, 0  ;;  %v113_v27 = vld [vmem:[%s4810_s0 + $0x81] sm:$0xff] }
  0x4e   :  { %1401 = vmatpush2.bf16.msra.mxu1 %v3552_v57  ;;  %1249 = vmatprep.subr.bf16.mxu0 %v3553_v58  ;;  %v531_v57 = vunpack.c.l.b16 %v366_v46  ;;  %v88_v58 = vpack.c.bf16 %v66_v47, %v66_v47  ;;  %v132_v47 = vpack.c.bf16 %v112_v36, %v112_v36 }
  0x4f   :  { %1402 = vmatprep.subr.bf16.mxu1 %v3555_v59  ;;  %v168_v59 = vpack.c.bf16 %v146_v48, %v146_v48 }
  0x50   :  { %v270_v1 = vsel %vm261_vm0, %v88_v58, 0 }
  0x51   :  { %1250 = vmatpush2.bf16.msra.mxu0 %v3557_v60  ;;  %v3579_v60 = vld [vmem:[#allocation6 + $0x254] ss:$8 sps:$4 sm:$0xff]   ;;  %v334_v2 = vsel %vm261_vm0, %v168_v59, 0  ;;  %v528_v6 = vunpack.c.l.b16 %v270_v1  ;;  %v310_v59 = vsel %vm261_vm0, %v132_v47, 0 }
  0x52   :  { %1403 = vmatpush2.bf16.msra.mxu1 %v3558_v61  ;;  %1251 = vmatprep.subr.bf16.mxu0 %v3559_v62  ;;  %v3151_v61 = vcombine.low %v266_v49, %v268_v50  ;;  %v3153_v62 = vcombine.low %v330_v51, %v332_v52  ;;  %v3586_v49 = vld [vmem:[#allocation6 + $0x220] ss:$8 sps:$4 sm:$0xff]   ;;  %v90_v50 = vpack.c.bf16 %v69_v29, %v69_v29 }
  0x53   :  { %1404 = vmatprep.subr.bf16.mxu1 %v3561_v63  ;;  %v714_v63 = vpack.c.b16 %v529_v56, %v524_v53  ;;  %v713_v21 = vpack.c.b16 %v528_v6, %v523_v5  ;;  %v91_v51 = vpack.c.bf16 %v71_v39, %v70_v30  ;;  %v89_v53 = vpack.c.bf16 %v68_v33, %v67_v32  ;;  %v193_v29 = vld [vmem:[%s4810_s0 + $0x83] sm:$0xff]  ;;  %v194_v30 = vld [vmem:[%s4810_s0 + $0x8b] sm:$0xff]  ;;  %v198_v39 = vld [vmem:[%s4810_s0 + $0xb3] sm:$0xff] }
  0x54   :  { %v75_v32 = vld [vmem:[%s4810_s0 + $0x90] sm:$0xff]  ;;  %v76_v33 = vld [vmem:[%s4810_s0 + $0xa0] sm:$0xff]  ;;  %v213_v47 = vpack.c.bf16 %v194_v30, %v193_v29 }
  0x55   :  { %1252 = vmatpush2.bf16.msra.mxu0 %v3563_v0  ;;  %v716_v0 = vpack.c.b16 %v531_v57, %v526_v54  ;;  %v169_v54 = vpack.c.bf16 %v148_v35, %v147_v34  ;;  %v276_v1 = vsel %vm261_vm0, %v91_v51, 0  ;;  %v77_v34 = vld [vmem:[%s4810_s0 + $0xa8] sm:$0xff]  ;;  %v118_v35 = vld [vmem:[%s4810_s0 + $0xb1] sm:$0xff] }
  0x56   :  { %1405 = vmatpush2.bf16.msra.mxu1 %v3564_v7  ;;  %1253 = vmatprep.subr.bf16.mxu0 %v3565_v8  ;;  %v525_v7 = vunpack.c.h.b16 %v332_v52  ;;  %v530_v8 = vunpack.c.l.b16 %v334_v2  ;;  %v3591_v52 = vld [vmem:[#allocation6 + $0x214] ss:$8 sps:$4 sm:$0xff]   ;;  %v3594_v2 = vld [vmem:[#allocation6 + $0x204] ss:$8 sps:$4 sm:$0xff]  }
  0x57   :  { %1406 = vmatprep.subr.bf16.mxu1 %v3567_v9  ;;  %v107_v9 = vld [vmem:[%s4810_s0 + $0x41] sm:$0xff]  ;;  %v154_v51 = vld [vmem:[%s4810_s0 + $0x8a] sm:$0xff] }
  0x58   :  { %v715_v22 = vpack.c.b16 %v530_v8, %v525_v7  ;;  %v129_v23 = vpack.c.bf16 %v108_v10, %v107_v9  ;;  %v559_v7 = vunpack.c.l.b16 %v310_v59 }
  0x59   :  { %1254 = vmatpush2.bf16.msra.mxu0 %v3569_v12  ;;  %v188_v12 = vld [vmem:[%s4810_s0 + $0x4b] sm:$0xff] }
  0x5a   :  { %1407 = vmatpush2.bf16.msra.mxu1 %v3570_v13  ;;  %1529 = vmatprep.subr.bf16.mxu0 %v3573_v28  ;;  %v109_v13 = vld [vmem:[%s4810_s0 + $0x51] sm:$0xff]  ;;  %v209_v24 = vpack.c.bf16 %v188_v12, %v187_v11  ;;  %v211_v28 = vpack.c.bf16 %v191_v18, %v190_v17  ;;  %v3592_v11 = vld [vmem:[#allocation6 + $0x200] ss:$8 sps:$4 sm:$0xff]  }
  0x5b   :  { %v130_v25 = vpack.c.bf16 %v109_v13, %v109_v13  ;;  %v115_v18 = vld [vmem:[%s4810_s0 + $0x91] sm:$0xff] }
  0x5c   :  { %3252 = vmatmul.mubr.msk.bf16.vlgmr.msra.gmra.mxu0 %vm261_vm0, %v85_v37  ;;  %v192_v37 = vld [vmem:[%s4810_s0 + $0x73] sm:$0xff]  ;;  %v372_v46 = vsel %vm261_vm0, %v211_v28, 0  ;;  %v114_v28 = vld [vmem:[%s4810_s0 + $0x89] sm:$0xff]  ;;  %v134_v36 = vpack.c.bf16 %v115_v18, %v115_v18 }
  0x5d   :  { %3260 = vmatmul.mubr.msk.bf16.vlgmr.msra.gmra.mxu1 %vm261_vm0, %v165_v38  ;;  %1530 = vmatpush1.bf16.msra.mxu0 %v3571_v41  ;;  %v3588_v38 = vld [vmem:[#allocation6 + $0x224] ss:$8 sps:$4 sm:$0xff]   ;;  %v306_v40 = vsel %vm261_vm0, %v130_v25, 0  ;;  %v308_v41 = vsel %vm261_vm0, %v131_v26, 0  ;;  %v212_v48 = vpack.c.bf16 %v192_v37, %v192_v37  ;;  %v3159_v58 = vcombine.low %v370_v45, %v372_v46  ;;  %v124_v18 = vld [vmem:[%s4810_s0 + $0xf1] sm:$0xff] }
  0x5e   :  { %1265 = vmatprep.mubr.bf16.mxu0 %v3152_v42  ;;  %1418 = vmatprep.mubr.bf16.mxu1 %v3154_v43  ;;  %v149_v42 = vld [vmem:[%s4810_s0 + $0x52] sm:$0xff]  ;;  %v150_v43 = vld [vmem:[%s4810_s0 + $0x62] sm:$0xff]  ;;  %v3157_v57 = vcombine.low %v306_v40, %v308_v41  ;;  %v554_v5 = vunpack.c.h.b16 %v308_v41  ;;  %v556_v6 = vunpack.c.h.b16 %v372_v46  ;;  %v157_v45 = vld [vmem:[%s4810_s0 + $0xaa] sm:$0xff]  ;;  %v133_v46 = vpack.c.bf16 %v114_v28, %v113_v27 }
  0x5f   :  { %1531 = vmatprep.subr.bf16.mxu0 %v3576_v44  ;;  %v151_v44 = vld [vmem:[%s4810_s0 + $0x6a] sm:$0xff] }
  0x60   :  { %v171_v56 = vpack.c.bf16 %v151_v44, %v150_v43  ;;  %v729_v14 = vpack.c.b16 %v559_v7, %v554_v5  ;;  %v156_v44 = vld [vmem:[%s4810_s0 + $0xa2] sm:$0xff]  ;;  %v203_v7 = vld [vmem:[%s4810_s0 + $0xeb] sm:$0xff] }
  0x61   :  { %1532 = vmatpush1.bf16.msra.mxu0 %v3574_v55  ;;  %v170_v55 = vpack.c.bf16 %v149_v42, %v149_v42 }
  0x62   :  { %1533 = vmatprep.subr.bf16.mxu0 %v3579_v60  ;;  %v374_v60 = vsel %vm261_vm0, %v212_v48, 0  ;;  %v73_v48 = vld [vmem:[%s4810_s0 + $0x80] sm:$0xff] }
  0x63   :  { %v561_v8 = vunpack.c.l.b16 %v374_v60 }
  0x64   :  { %1266 = vmatmul.mubr.bf16.gmra.mxu0 %v3151_v61  ;;  %v72_v61 = vld [vmem:[%s4810_s0 + $0x70] sm:$0xff] }
  0x65   :  { %1419 = vmatmul.mubr.bf16.gmra.mxu1 %v3153_v62  ;;  %1275 = vmatprep.mubr.bf16.mxu0 %v714_v63  ;;  %v152_v62 = vld [vmem:[%s4810_s0 + $0x72] sm:$0xff]  ;;  %v92_v9 = vpack.c.bf16 %v72_v61, %v72_v61  ;;  %v731_v15 = vpack.c.b16 %v561_v8, %v556_v6  ;;  %v216_v61 = vpack.c.bf16 %v198_v39, %v198_v39  ;;  %v202_v6 = vld [vmem:[%s4810_s0 + $0xe3] sm:$0xff] }
  0x66   :  { %1428 = vmatprep.mubr.bf16.mxu1 %v716_v0  ;;  %1534 = vmatpush1.bf16.msra.mxu0 %v3577_v3  ;;  %v3589_v63 = vld [vmem:[#allocation6 + $0x210] ss:$8 sps:$4 sm:$0xff]   ;;  %v274_v0 = vsel %vm261_vm0, %v90_v50, 0  ;;  %v338_v3 = vsel %vm261_vm0, %v170_v55, 0  ;;  %v172_v10 = vpack.c.bf16 %v152_v62, %v152_v62  ;;  %v153_v50 = vld [vmem:[%s4810_s0 + $0x82] sm:$0xff]  ;;  %v95_v55 = vpack.c.bf16 %v77_v34, %v76_v33 }
  0x67   :  { %1535 = vmatprep.subr.bf16.mxu0 %v3582_v4  ;;  %v340_v4 = vsel %vm261_vm0, %v171_v56, 0  ;;  %v3156_v12 = vcombine.low %v274_v0, %v276_v1  ;;  %v278_v16 = vsel %vm261_vm0, %v92_v9, 0  ;;  %v136_v56 = vpack.c.bf16 %v118_v35, %v118_v35  ;;  %v158_v62 = vld [vmem:[%s4810_s0 + $0xb2] sm:$0xff]  ;;  %v82_v9 = vld [vmem:[%s4810_s0 + $0xe0] sm:$0xff] }
  0x68   :  { %v3158_v13 = vcombine.low %v338_v3, %v340_v4  ;;  %v342_v17 = vsel %vm261_vm0, %v172_v10, 0  ;;  %v555_v25 = vunpack.c.h.b16 %v340_v4  ;;  %v121_v0 = vld [vmem:[%s4810_s0 + $0xd1] sm:$0xff]  ;;  %v173_v5 = vpack.c.bf16 %v154_v51, %v153_v50  ;;  %v83_v10 = vld [vmem:[%s4810_s0 + $0xe8] sm:$0xff] }
  0x69   :  { %v560_v26 = vunpack.c.l.b16 %v342_v17  ;;  %v201_v3 = vld [vmem:[%s4810_s0 + $0xd3] sm:$0xff]  ;;  %v163_v17 = vld [vmem:[%s4810_s0 + $0xea] sm:$0xff]  ;;  %v176_v29 = vpack.c.bf16 %v158_v62, %v158_v62  ;;  %v219_v35 = vpack.c.bf16 %v203_v7, %v202_v6 }
  0x6a   :  { %1536 = vmatpush1.bf16.msra.mxu0 %v3580_v19  ;;  %v116_v19 = vld [vmem:[%s4810_s0 + $0xa1] sm:$0xff]  ;;  %v81_v8 = vld [vmem:[%s4810_s0 + $0xd0] sm:$0xff]  ;;  %v218_v33 = vpack.c.bf16 %v201_v3, %v201_v3 }
  0x6b   :  { %1537 = vmatprep.subr.bf16.mxu0 %v3585_v20  ;;  %v117_v20 = vld [vmem:[%s4810_s0 + $0xa9] sm:$0xff]  ;;  %v730_v41 = vpack.c.b16 %v560_v26, %v555_v25  ;;  %v164_v25 = vld [vmem:[%s4810_s0 + $0xf2] sm:$0xff]  ;;  %v388_v51 = vsel %vm261_vm0, %v219_v35, 0 }
  0x6c   :  { %1276 = vmatmul.mubr.bf16.gmra.mxu0 %v713_v21  ;;  %v195_v21 = vld [vmem:[%s4810_s0 + $0x93] sm:$0xff]  ;;  %v135_v37 = vpack.c.bf16 %v117_v20, %v116_v19  ;;  %v284_v19 = vsel %vm261_vm0, %v95_v55, 0  ;;  %v120_v3 = vld [vmem:[%s4810_s0 + $0xc9] sm:$0xff] }
  0x6d   :  { %1429 = vmatmul.mubr.bf16.gmra.mxu1 %v715_v22  ;;  %3253 = vmatprep.mubr.msk.bf16.mxu0 %vm261_vm0, %v129_v23  ;;  %v196_v22 = vld [vmem:[%s4810_s0 + $0xa3] sm:$0xff]  ;;  %v553_v23 = vunpack.c.h.b16 %v276_v1  ;;  %v214_v42 = vpack.c.bf16 %v195_v21, %v195_v21  ;;  %v382_v21 = vsel %vm261_vm0, %v216_v61, 0  ;;  %v583_v62 = vunpack.c.h.b16 %v284_v19  ;;  %v223_v35 = vld [vmem:[%s4810_s0 + $0x14] sm:$0xff] }
  0x6e   :  { %3261 = vmatprep.mubr.msk.bf16.mxu1 %vm261_vm0, %v209_v24  ;;  %1538 = vmatpush1.bf16.msra.mxu0 %v3583_v31  ;;  %v558_v24 = vunpack.c.l.b16 %v278_v16  ;;  %v197_v31 = vld [vmem:[%s4810_s0 + $0xab] sm:$0xff]  ;;  %v122_v1 = vld [vmem:[%s4810_s0 + $0xe1] sm:$0xff]  ;;  %v591_v34 = vunpack.c.l.b16 %v382_v21 }
  0x6f   :  { %1539 = vmatprep.subr.bf16.mxu0 %v3588_v38  ;;  %v155_v38 = vld [vmem:[%s4810_s0 + $0x92] sm:$0xff]  ;;  %v215_v43 = vpack.c.bf16 %v197_v31, %v196_v22  ;;  %v162_v16 = vld [vmem:[%s4810_s0 + $0xe2] sm:$0xff]  ;;  %v138_v31 = vpack.c.bf16 %v121_v0, %v121_v0 }
  0x70   :  { %v728_v40 = vpack.c.b16 %v558_v24, %v553_v23  ;;  %v174_v60 = vpack.c.bf16 %v155_v38, %v155_v38  ;;  %v204_v23 = vld [vmem:[%s4810_s0 + $0xf3] sm:$0xff] }
  0x71   :  { %v4113_v59 = vsel %vm261_vm0, %v215_v43, 0  ;;  %v84_v24 = vld [vmem:[%s4810_s0 + $0xf0] sm:$0xff]  ;;  %v220_v43 = vpack.c.bf16 %v204_v23, %v204_v23 }
  0x72   :  { %1540 = vmatpush1.bf16.msra.mxu0 %v3586_v49  ;;  %v74_v49 = vld [vmem:[%s4810_s0 + $0x88] sm:$0xff]  ;;  %v346_v20 = vsel %vm261_vm0, %v174_v60, 0  ;;  %v586_v28 = vunpack.c.h.b16 %v4113_v59 }
  0x73   :  { %1541 = vmatprep.subr.bf16.mxu0 %v3591_v52  ;;  %v94_v52 = vpack.c.bf16 %v75_v32, %v75_v32  ;;  %v93_v4 = vpack.c.bf16 %v74_v49, %v73_v48  ;;  %v386_v49 = vsel %vm261_vm0, %v218_v33, 0  ;;  %v221_v33 = vld [vmem:[%s4810_s0 + $0x4] sm:$0xff] }
  0x74   :  { %3254 = vmatmul.mubr.msk.bf16.gmra.mxu0 %vm261_vm0, %v89_v53  ;;  %v314_v53 = vsel %vm261_vm0, %v134_v36, 0  ;;  %v98_v36 = vpack.c.bf16 %v81_v8, %v81_v8 }
  0x75   :  { %3262 = vmatmul.mubr.msk.bf16.gmra.mxu1 %vm261_vm0, %v169_v54  ;;  %1295 = vmatprep.mubr.bf16.mxu0 %v3157_v57  ;;  %v4106_v54 = vsel %vm261_vm0, %v135_v37, 0  ;;  %v78_v57 = vld [vmem:[%s4810_s0 + $0xb0] sm:$0xff]  ;;  %v99_v37 = vpack.c.bf16 %v83_v10, %v82_v9  ;;  %v79_v10 = vld [vmem:[%s4810_s0 + $0xc0] sm:$0xff] }
  0x76   :  { %1448 = vmatprep.mubr.bf16.mxu1 %v3159_v58  ;;  %1542 = vmatpush1.bf16.msra.mxu0 %v3589_v63  ;;  %v378_v58 = vsel %vm261_vm0, %v214_v42, 0  ;;  %v175_v63 = vpack.c.bf16 %v157_v45, %v156_v44  ;;  %v96_v22 = vpack.c.bf16 %v78_v57, %v78_v57  ;;  %v584_v27 = vunpack.c.h.b16 %v4106_v54 }
  0x77   :  { %1543 = vmatprep.subr.bf16.mxu0 %v3594_v2  ;;  %v123_v2 = vld [vmem:[%s4810_s0 + $0xe9] sm:$0xff]  ;;  %v350_v42 = vsel %vm261_vm0, %v176_v29, 0  ;;  %v100_v44 = vpack.c.bf16 %v84_v24, %v84_v24  ;;  %v180_v45 = vpack.c.bf16 %v164_v25, %v164_v25 }
  0x78   :  { %v348_v26 = vsel %vm261_vm0, %v175_v63, 0  ;;  %v139_v32 = vpack.c.bf16 %v123_v2, %v122_v1  ;;  %v286_v38 = vsel %vm261_vm0, %v96_v22, 0  ;;  %v590_v1 = vunpack.c.l.b16 %v350_v42  ;;  %v119_v2 = vld [vmem:[%s4810_s0 + $0xc1] sm:$0xff] }
  0x79   :  { %v3163_v50 = vcombine.low %v346_v20, %v348_v26  ;;  %v294_v60 = vsel %vm261_vm0, %v100_v44, 0  ;;  %v358_v61 = vsel %vm261_vm0, %v180_v45, 0  ;;  %v588_v63 = vunpack.c.l.b16 %v286_v38 }
  0x7a   :  { %1544 = vmatpush1.bf16.msra.mxu0 %v3592_v11  ;;  %v3162_v11 = vcombine.low %v314_v53, %v4106_v54  ;;  %v324_v48 = vsel %vm261_vm0, %v139_v32, 0  ;;  %v292_v53 = vsel %vm261_vm0, %v99_v37, 0  ;;  %v585_v0 = vunpack.c.h.b16 %v348_v26  ;;  %v225_v37 = vld [vmem:[%s4810_s0 + $0x2c] sm:$0xff] }
  0x7b   :  { %v743_v6 = vpack.c.b16 %v588_v63, %v583_v62  ;;  %v137_v8 = vpack.c.bf16 %v120_v3, %v119_v2  ;;  %v616_v20 = vunpack.c.h.b16 %v388_v51  ;;  %v613_v26 = vunpack.c.h.b16 %v292_v53  ;;  %v3595_v3 = vld [vmem:[#allocation8 + $0x70] ss:$8 sps:$4 sm:$0xff]  }
  0x7c   :  { %1296 = vmatmul.mubr.bf16.gmra.mxu0 %v3156_v12  ;;  %v3164_v12 = vcombine.low %v378_v58, %v4113_v59  ;;  %v746_v58 = vpack.c.b16 %v591_v34, %v586_v28  ;;  %v390_v59 = vsel %vm261_vm0, %v220_v43, 0  ;;  %v745_v7 = vpack.c.b16 %v590_v1, %v585_v0  ;;  %v222_v34 = vld [vmem:[%s4810_s0 + $0xc] sm:$0xff] }
  0x7d   :  { %1449 = vmatmul.mubr.bf16.gmra.mxu1 %v3158_v13  ;;  %1305 = vmatprep.mubr.bf16.mxu0 %v729_v14  ;;  %v282_v13 = vsel %vm261_vm0, %v94_v52, 0  ;;  %v318_v14 = vsel %vm261_vm0, %v136_v56, 0  ;;  %v290_v52 = vsel %vm261_vm0, %v98_v36, 0  ;;  %v621_v21 = vunpack.c.l.b16 %v390_v59  ;;  %v224_v36 = vld [vmem:[%s4810_s0 + $0x24] sm:$0xff] }
  0x7e   :  { %1458 = vmatprep.mubr.bf16.mxu1 %v731_v15  ;;  %v161_v15 = vld [vmem:[%s4810_s0 + $0xd2] sm:$0xff]  ;;  %v589_v30 = vunpack.c.l.b16 %v318_v14  ;;  %v3166_v22 = vcombine.low %v290_v52, %v292_v53  ;;  %v620_v29 = vunpack.c.l.b16 %v358_v61  ;;  %v4820_v32 = vmov 0   ;;  %v230_v53 = vld [vmem:[%s4810_s0 + $0x64] sm:$0xff] }
  0x7f   :  { %v178_v39 = vpack.c.bf16 %v161_v15, %v161_v15  ;;  %v761_v25 = vpack.c.b16 %v621_v21, %v616_v20  ;;  %v245_v38 = vpack.c.bf16 %v222_v34, %v221_v33  ;;  %v229_v52 = vld [vmem:[%s4810_s0 + $0x54] sm:$0xff]  ;;  %v242_v34 = vld [vmem:[%s4810_s0 + $0xe4] sm:$0xff] }
  0x80   :  { %v744_v54 = vpack.c.b16 %v589_v30, %v584_v27  ;;  %v618_v27 = vunpack.c.l.b16 %v294_v60  ;;  %v3603_v20 = vld [vmem:[#allocation8 + $0x54] ss:$8 sps:$4 sm:$0xff]  }
  0x81   :  { %v354_v55 = vsel %vm261_vm0, %v178_v39, 0  ;;  %v246_v39 = vpack.c.bf16 %v223_v35, %v223_v35  ;;  %v241_v33 = vld [vmem:[%s4810_s0 + $0xd4] sm:$0xff]  ;;  %v243_v35 = vld [vmem:[%s4810_s0 + $0xec] sm:$0xff] }
  0x82   :  { %v758_v30 = vpack.c.b16 %v618_v27, %v613_v26 }
  0x83   :  { %v394_v42 = vsel %vm261_vm0, %v246_v39, 0  ;;  %v244_v39 = vld [vmem:[%s4810_s0 + $0xf4] sm:$0xff] }
  0x84   :  { %1306 = vmatmul.mubr.bf16.gmra.mxu0 %v728_v40  ;;  %v179_v40 = vpack.c.bf16 %v163_v17, %v162_v16  ;;  %v3169_v17 = vcombine.low %v386_v49, %v388_v51  ;;  %v228_v51 = vld [vmem:[%s4810_s0 + $0x4c] sm:$0xff] }
  0x85   :  { %1459 = vmatmul.mubr.bf16.gmra.mxu1 %v730_v41  ;;  %3255 = vmatprep.mubr.msk.bf16.mxu0 %vm261_vm0, %v133_v46  ;;  %v140_v41 = vpack.c.bf16 %v124_v18, %v124_v18  ;;  %v3161_v46 = vcombine.low %v282_v13, %v284_v19  ;;  %v160_v13 = vld [vmem:[%s4810_s0 + $0xca] sm:$0xff]  ;;  %v614_v18 = vunpack.c.h.b16 %v324_v48 }
  0x86   :  { %3263 = vmatprep.mubr.msk.bf16.mxu1 %vm261_vm0, %v213_v47  ;;  %v322_v47 = vsel %vm261_vm0, %v138_v31, 0  ;;  %v356_v56 = vsel %vm261_vm0, %v179_v40, 0  ;;  %v247_v40 = vpack.c.bf16 %v225_v37, %v224_v36  ;;  %v258_v37 = vpack.c.bf16 %v241_v33, %v241_v33  ;;  %v3661_v33 = vld [vmem:[#allocation8 + $0x200] ss:$8 sps:$4 sm:$0xff]  }
  0x87   :  { %v326_v57 = vsel %vm261_vm0, %v140_v41, 0  ;;  %v3167_v16 = vcombine.low %v322_v47, %v324_v48  ;;  %v3168_v23 = vcombine.low %v354_v55, %v356_v56  ;;  %v615_v28 = vunpack.c.h.b16 %v356_v56  ;;  %v226_v41 = vld [vmem:[%s4810_s0 + $0x34] sm:$0xff] }
  0x88   :  { %v619_v19 = vunpack.c.l.b16 %v326_v57  ;;  %v396_v43 = vsel %vm261_vm0, %v247_v40, 0  ;;  %v248_v44 = vpack.c.bf16 %v226_v41, %v226_v41  ;;  %v250_v56 = vpack.c.bf16 %v229_v52, %v229_v52  ;;  %v3612_v40 = vld [vmem:[#allocation8 + $0x24] ss:$8 sps:$4 sm:$0xff]   ;;  %v3610_v41 = vld [vmem:[#allocation8 + $0x20] ss:$8 sps:$4 sm:$0xff]  }
  0x89   :  { %v760_v31 = vpack.c.b16 %v620_v29, %v615_v28  ;;  %v3155_v45 = vcombine.low %v394_v42, %v396_v43  ;;  %v527_v47 = vunpack.c.h.b16 %v396_v43  ;;  %v3607_v28 = vld [vmem:[#allocation8 + $0x30] ss:$8 sps:$4 sm:$0xff]   ;;  %v3609_v29 = vld [vmem:[#allocation8 + $0x34] ss:$8 sps:$4 sm:$0xff]   ;;  %v418_v42 = vsel %vm261_vm0, %v258_v37, 0 }
  0x8a   :  { %v759_v24 = vpack.c.b16 %v619_v19, %v614_v18  ;;  %v402_v59 = vsel %vm261_vm0, %v250_v56, 0  ;;  %v3601_v19 = vld [vmem:[#allocation8 + $0x50] ss:$8 sps:$4 sm:$0xff]  }
  0x8b   :  { %v3622_v56 = vld [vmem:[#allocation8 + $0xf0] ss:$8 sps:$4 sm:$0xff]  }
  0x8c   :  { %3256 = vmatmul.mubr.msk.bf16.gmra.mxu0 %vm261_vm0, %v93_v4  ;;  %v199_v4 = vld [vmem:[%s4810_s0 + $0xc3] sm:$0xff] }
  0x8d   :  { %3264 = vmatmul.mubr.msk.bf16.gmra.mxu1 %vm261_vm0, %v173_v5  ;;  %1325 = vmatprep.mubr.bf16.mxu0 %v3162_v11  ;;  %v200_v5 = vld [vmem:[%s4810_s0 + $0xcb] sm:$0xff] }
  0x8e   :  { %1478 = vmatprep.mubr.bf16.mxu1 %v3164_v12  ;;  %v217_v9 = vpack.c.bf16 %v200_v5, %v199_v4  ;;  %v80_v11 = vld [vmem:[%s4810_s0 + $0xc8] sm:$0xff]  ;;  %v3597_v4 = vld [vmem:[#allocation8 + $0x74] ss:$8 sps:$4 sm:$0xff]  }
  0x8f   :  { %v159_v12 = vld [vmem:[%s4810_s0 + $0xc2] sm:$0xff]  ;;  %v97_v14 = vpack.c.bf16 %v80_v11, %v79_v10  ;;  %2404 = vmatprep.subr.bf16.mxu1 %v3597_v4 }
  0x90   :  { %v177_v15 = vpack.c.bf16 %v160_v13, %v159_v12  ;;  %2405 = vmatpush1.bf16.msra.mxu1 %v3595_v3  ;;  %v233_v5 = vld [vmem:[%s4810_s0 + $0x84] sm:$0xff] }
  0x91   :  { %v3598_v10 = vld [vmem:[#allocation8 + $0x60] ss:$8 sps:$4 sm:$0xff]   ;;  %v3600_v11 = vld [vmem:[#allocation8 + $0x64] ss:$8 sps:$4 sm:$0xff]  }
  0x92   :  { %2406 = vmatprep.subr.bf16.mxu1 %v3600_v11  ;;  %v3637_v3 = vld [vmem:[#allocation8 + $0x240] ss:$8 sps:$4 sm:$0xff]   ;;  %v3642_v4 = vld [vmem:[#allocation8 + $0xc4] ss:$8 sps:$4 sm:$0xff]   ;;  %v3643_v11 = vld [vmem:[#allocation8 + $0x230] ss:$8 sps:$4 sm:$0xff]  }
  0x94   :  { %1326 = vmatmul.mubr.bf16.gmra.mxu0 %v3161_v46  ;;  %v398_v46 = vsel %vm261_vm0, %v248_v44, 0  ;;  %2407 = vmatpush1.bf16.msra.mxu1 %v3598_v10  ;;  %v260_v44 = vpack.c.bf16 %v244_v39, %v244_v39 }
  0x95   :  { %1479 = vmatmul.mubr.bf16.gmra.mxu1 %v3163_v50  ;;  %1335 = vmatprep.mubr.bf16.mxu0 %v744_v54  ;;  %v532_v48 = vunpack.c.l.b16 %v398_v46  ;;  %v227_v50 = vld [vmem:[%s4810_s0 + $0x44] sm:$0xff]  ;;  %v231_v54 = vld [vmem:[%s4810_s0 + $0x6c] sm:$0xff] }
  0x96   :  { %1488 = vmatprep.mubr.bf16.mxu1 %v746_v58  ;;  %v249_v55 = vpack.c.bf16 %v228_v51, %v227_v50  ;;  %v251_v57 = vpack.c.bf16 %v231_v54, %v230_v53  ;;  %v232_v58 = vld [vmem:[%s4810_s0 + $0x74] sm:$0xff]  ;;  %2408 = vmatprep.subr.bf16.mxu1 %v3603_v20  ;;  %v3616_v50 = vld [vmem:[#allocation8] ss:$8 sps:$4 sm:$0xff]  }
  0x97   :  { %v717_v49 = vpack.c.b16 %v532_v48, %v527_v47  ;;  %v252_v61 = vpack.c.bf16 %v232_v58, %v232_v58  ;;  %v3613_v46 = vld [vmem:[#allocation8 + $0x10] ss:$8 sps:$4 sm:$0xff]   ;;  %v422_v48 = vsel %vm261_vm0, %v260_v44, 0  ;;  %v3621_v53 = vld [vmem:[#allocation8 + $0x274] ss:$8 sps:$4 sm:$0xff]  }
  0x98   :  { %v404_v60 = vsel %vm261_vm0, %v251_v57, 0  ;;  %2409 = vmatpush1.bf16.msra.mxu1 %v3601_v19  ;;  %v622_v52 = vunpack.c.l.b16 %v422_v48  ;;  %v3619_v54 = vld [vmem:[#allocation8 + $0x270] ss:$8 sps:$4 sm:$0xff]   ;;  %2550 = vmatprep.subr.bf16.mxu0 %v3621_v53  ;;  %v3627_v58 = vld [vmem:[#allocation8 + $0x264] ss:$8 sps:$4 sm:$0xff]  }
  0x99   :  { %v3160_v62 = vcombine.low %v402_v59, %v404_v60  ;;  %v406_v63 = vsel %vm261_vm0, %v252_v61, 0  ;;  %v557_v0 = vunpack.c.h.b16 %v404_v60  ;;  %v3625_v59 = vld [vmem:[#allocation8 + $0x260] ss:$8 sps:$4 sm:$0xff]   ;;  %v3630_v60 = vld [vmem:[#allocation8 + $0xe4] ss:$8 sps:$4 sm:$0xff]  }
  0x9a   :  { %v562_v1 = vunpack.c.l.b16 %v406_v63  ;;  %v3628_v61 = vld [vmem:[#allocation8 + $0xe0] ss:$8 sps:$4 sm:$0xff]   ;;  %v3631_v63 = vld [vmem:[#allocation8 + $0x250] ss:$8 sps:$4 sm:$0xff]   ;;  %v3654_v19 = vld [vmem:[#allocation8 + $0xa4] ss:$8 sps:$4 sm:$0xff]  }
  0x9b   :  { %v3652_v20 = vld [vmem:[#allocation8 + $0xa0] ss:$8 sps:$4 sm:$0xff]  }
  0x9c   :  { %1336 = vmatmul.mubr.bf16.gmra.mxu0 %v743_v6  ;;  %v732_v2 = vpack.c.b16 %v562_v1, %v557_v0  ;;  %v234_v6 = vld [vmem:[%s4810_s0 + $0x8c] sm:$0xff]  ;;  %v3636_v0 = vld [vmem:[#allocation8 + $0xd4] ss:$8 sps:$4 sm:$0xff]  }
  0x9d   :  { %1489 = vmatmul.mubr.bf16.gmra.mxu1 %v745_v7  ;;  %3257 = vmatprep.mubr.msk.bf16.mxu0 %vm261_vm0, %v137_v8  ;;  %v235_v7 = vld [vmem:[%s4810_s0 + $0x94] sm:$0xff]  ;;  %v236_v8 = vld [vmem:[%s4810_s0 + $0xa4] sm:$0xff]  ;;  %v253_v12 = vpack.c.bf16 %v234_v6, %v233_v5 }
  0x9e   :  { %3265 = vmatprep.mubr.msk.bf16.mxu1 %vm261_vm0, %v217_v9  ;;  %v237_v9 = vld [vmem:[%s4810_s0 + $0xac] sm:$0xff]  ;;  %v254_v13 = vpack.c.bf16 %v235_v7, %v235_v7  ;;  %v3640_v5 = vld [vmem:[#allocation8 + $0xc0] ss:$8 sps:$4 sm:$0xff]  }
  0x9f   :  { %v3634_v1 = vld [vmem:[#allocation8 + $0xd0] ss:$8 sps:$4 sm:$0xff]  }
  0xa4   :  { %3258 = vmatmul.mubr.msk.bf16.gmra.mxu0 %vm261_vm0, %v97_v14  ;;  %v255_v14 = vpack.c.bf16 %v237_v9, %v236_v8  ;;  %v3645_v8 = vld [vmem:[#allocation8 + $0x234] ss:$8 sps:$4 sm:$0xff]  }
  0xa5   :  { %3266 = vmatmul.mubr.msk.bf16.gmra.mxu1 %vm261_vm0, %v177_v15  ;;  %1355 = vmatprep.mubr.bf16.mxu0 %v3167_v16  ;;  %v238_v15 = vld [vmem:[%s4810_s0 + $0xb4] sm:$0xff]  ;;  %v410_v16 = vsel %vm261_vm0, %v254_v13, 0 }
  0xa6   :  { %1508 = vmatprep.mubr.bf16.mxu1 %v3169_v17  ;;  %v412_v17 = vsel %vm261_vm0, %v255_v14, 0  ;;  %v256_v18 = vpack.c.bf16 %v238_v15, %v238_v15  ;;  %v3646_v13 = vld [vmem:[#allocation8 + $0xb0] ss:$8 sps:$4 sm:$0xff]   ;;  %v3651_v15 = vld [vmem:[#allocation8 + $0x224] ss:$8 sps:$4 sm:$0xff]  }
  0xa7   :  { %v3165_v21 = vcombine.low %v410_v16, %v412_v17 }
  0xac   :  { %1356 = vmatmul.mubr.bf16.gmra.mxu0 %v3166_v22  ;;  %v414_v22 = vsel %vm261_vm0, %v256_v18, 0  ;;  %v3649_v18 = vld [vmem:[#allocation8 + $0x220] ss:$8 sps:$4 sm:$0xff]  }
  0xad   :  { %1509 = vmatmul.mubr.bf16.gmra.mxu1 %v3168_v23  ;;  %1365 = vmatprep.mubr.bf16.mxu0 %v759_v24  ;;  %v3604_v23 = vld [vmem:[#allocation8 + $0x40] ss:$8 sps:$4 sm:$0xff]   ;;  %v3606_v24 = vld [vmem:[#allocation8 + $0x44] ss:$8 sps:$4 sm:$0xff]   ;;  %v592_v26 = vunpack.c.l.b16 %v414_v22  ;;  %v3657_v22 = vld [vmem:[#allocation8 + $0x214] ss:$8 sps:$4 sm:$0xff]  }
  0xae   :  { %1518 = vmatprep.mubr.bf16.mxu1 %v761_v25  ;;  %v587_v25 = vunpack.c.h.b16 %v412_v17  ;;  %2410 = vmatprep.subr.bf16.mxu1 %v3606_v24 }
  0xaf   :  { %2411 = vmatpush1.bf16.msra.mxu1 %v3604_v23 }
  0xb0   :  { %v747_v27 = vpack.c.b16 %v592_v26, %v587_v25  ;;  %2412 = vmatprep.subr.bf16.mxu1 %v3609_v29  ;;  %v3655_v25 = vld [vmem:[#allocation8 + $0x210] ss:$8 sps:$4 sm:$0xff]   ;;  %v3660_v26 = vld [vmem:[#allocation8 + $0x94] ss:$8 sps:$4 sm:$0xff]   ;;  %v3663_v29 = vld [vmem:[#allocation8 + $0x204] ss:$8 sps:$4 sm:$0xff]  }
  0xb3   :  { %2413 = vmatpush1.bf16.msra.mxu1 %v3607_v28 }
  0xb4   :  { %1366 = vmatmul.mubr.bf16.gmra.mxu0 %v758_v30  ;;  %v239_v30 = vld [vmem:[%s4810_s0 + $0xc4] sm:$0xff]  ;;  %2414 = vmatprep.subr.bf16.mxu1 %v3612_v40 }
  0xb5   :  { %1519 = vmatmul.mubr.bf16.gmra.mxu1 %v760_v31  ;;  %1561 = vmatprep.mubr.bf16.mxu0 %v4820_v32  ;;  %v240_v31 = vld [vmem:[%s4810_s0 + $0xcc] sm:$0xff] }
  0xb6   :  { %v257_v36 = vpack.c.bf16 %v240_v31, %v239_v30 }
  0xb7   :  { %2415 = vmatpush1.bf16.msra.mxu1 %v3610_v41 }
  0xbc   :  { %3267 = vmatmul.mubr.msk.bf16.vlgmr.msra.gmra.mxu0 %vm261_vm0, %v245_v38  ;;  %v259_v38 = vpack.c.bf16 %v243_v35, %v242_v34  ;;  %v3666_v34 = vld [vmem:[#allocation8 + $0x84] ss:$8 sps:$4 sm:$0xff]   ;;  %v3664_v35 = vld [vmem:[#allocation8 + $0x80] ss:$8 sps:$4 sm:$0xff]  }
  0xbd   :  { %1571 = vmatprep.mubr.bf16.mxu0 %v4820_v32  ;;  %2551 = vmatpush1.bf16.msra.mxu0 %v3619_v54 }
  0xbe   :  { %v420_v43 = vsel %vm261_vm0, %v259_v38, 0  ;;  %2552 = vmatprep.subr.bf16.mxu0 %v3627_v58 }
  0xbf   :  { %v3170_v47 = vcombine.low %v418_v42, %v420_v43  ;;  %v617_v51 = vunpack.c.h.b16 %v420_v43 }
  0xc1   :  { %v762_v57 = vpack.c.b16 %v622_v52, %v617_v51  ;;  %2553 = vmatpush1.bf16.msra.mxu0 %v3625_v59  ;;  %v3669_v51 = vld [vmem:[#allocation8 + $0x174] ss:$8 sps:$4 sm:$0xff]  }
  0xc4   :  { %1572 = vmatmul.mubr.bf16.gmra.mxu0 %v3155_v45  ;;  %v3615_v45 = vld [vmem:[#allocation8 + $0x14] ss:$8 sps:$4 sm:$0xff]  }
  0xc5   :  { %1581 = vmatprep.mubr.bf16.mxu0 %v4820_v32  ;;  %2416 = vmatprep.subr.bf16.mxu1 %v3615_v45 }
  0xc6   :  { %2417 = vmatpush1.bf16.msra.mxu1 %v3613_v46 }
  0xcc   :  { %1582 = vmatmul.mubr.bf16.gmra.mxu0 %v717_v49  ;;  %v3618_v49 = vld [vmem:[#allocation8 + $0x4] ss:$8 sps:$4 sm:$0xff]  }
  0xcd   :  { %1591 = vmatprep.mubr.bf16.mxu0 %v4820_v32  ;;  %2418 = vmatprep.subr.bf16.mxu1 %v3618_v49 }
  0xce   :  { %2419 = vmatpush1.bf16.msra.mxu1 %v3616_v50 }
  0xd4   :  { %3268 = vmatmul.mubr.msk.bf16.gmra.mxu0 %vm261_vm0, %v249_v55  ;;  %v3624_v55 = vld [vmem:[#allocation8 + $0xf4] ss:$8 sps:$4 sm:$0xff]  }
  0xd5   :  { %1601 = vmatprep.mubr.bf16.mxu0 %v4820_v32  ;;  %2420 = vmatprep.subr.bf16.mxu1 %v3624_v55 }
  0xd6   :  { %2421 = vmatpush2.bf16.msra.mxu1 %v3622_v56 }
  0xd7   :  { %2422 = vmatprep.subr.bf16.mxu1 %v3630_v60 }
  0xda   :  { %2423 = vmatpush2.bf16.msra.mxu1 %v3628_v61 }
  0xdb   :  { %2424 = vmatprep.subr.bf16.mxu1 %v3636_v0 }
  0xdc   :  { %1602 = vmatmul.mubr.bf16.gmra.mxu0 %v3160_v62  ;;  %v3633_v62 = vld [vmem:[#allocation8 + $0x254] ss:$8 sps:$4 sm:$0xff]  }
  0xdd   :  { %1611 = vmatprep.mubr.bf16.mxu0 %v4820_v32  ;;  %2554 = vmatprep.subr.bf16.mxu0 %v3633_v62 }
  0xde   :  { %2555 = vmatpush1.bf16.msra.mxu0 %v3631_v63  ;;  %2425 = vmatpush2.bf16.msra.mxu1 %v3634_v1 }
  0xdf   :  { %2426 = vmatprep.subr.bf16.mxu1 %v3642_v4 }
  0xe2   :  { %2427 = vmatpush2.bf16.msra.mxu1 %v3640_v5 }
  0xe4   :  { %1612 = vmatmul.mubr.bf16.gmra.mxu0 %v732_v2  ;;  %v3639_v2 = vld [vmem:[#allocation8 + $0x244] ss:$8 sps:$4 sm:$0xff]  }
  0xe5   :  { %1621 = vmatprep.mubr.bf16.mxu0 %v4820_v32  ;;  %2556 = vmatprep.subr.bf16.mxu0 %v3639_v2 }
  0xe6   :  { %2557 = vmatpush1.bf16.msra.mxu0 %v3637_v3 }
  0xe7   :  { %2558 = vmatprep.subr.bf16.mxu0 %v3645_v8 }
  0xea   :  { %2559 = vmatpush1.bf16.msra.mxu0 %v3643_v11 }
  0xeb   :  { %2560 = vmatprep.subr.bf16.mxu0 %v3651_v15 }
  0xec   :  { %3269 = vmatmul.mubr.msk.bf16.gmra.mxu0 %vm261_vm0, %v253_v12  ;;  %v3648_v12 = vld [vmem:[#allocation8 + $0xb4] ss:$8 sps:$4 sm:$0xff]  }
  0xed   :  { %1631 = vmatprep.mubr.bf16.mxu0 %v4820_v32  ;;  %2428 = vmatprep.subr.bf16.mxu1 %v3648_v12 }
  0xee   :  { %2429 = vmatpush2.bf16.msra.mxu1 %v3646_v13  ;;  %2561 = vmatpush1.bf16.msra.mxu0 %v3649_v18 }
  0xef   :  { %2430 = vmatprep.subr.bf16.mxu1 %v3654_v19  ;;  %2562 = vmatprep.subr.bf16.mxu0 %v3657_v22 }
  0xf2   :  { %2431 = vmatpush2.bf16.msra.mxu1 %v3652_v20  ;;  %2563 = vmatpush1.bf16.msra.mxu0 %v3655_v25 }
  0xf3   :  { %2432 = vmatprep.subr.bf16.mxu1 %v3660_v26  ;;  %2564 = vmatprep.subr.bf16.mxu0 %v3663_v29 }
  0xf4   :  { %1632 = vmatmul.mubr.bf16.gmra.mxu0 %v3165_v21 }
  0xf5   :  { %1641 = vmatprep.mubr.bf16.mxu0 %v4820_v32 }
  0xf6   :  { %2565 = vmatpush1.bf16.msra.mxu0 %v3661_v33 }
  0xfc   :  { %1642 = vmatmul.mubr.bf16.gmra.mxu0 %v747_v27  ;;  %v3658_v27 = vld [vmem:[#allocation8 + $0x90] ss:$8 sps:$4 sm:$0xff]  }
  0xfd   :  { %1651 = vmatprep.mubr.bf16.mxu0 %v4820_v32  ;;  %2433 = vmatpush2.bf16.msra.mxu1 %v3658_v27 }
  0xfe   :  { %2434 = vmatprep.subr.bf16.mxu1 %v3666_v34 }
 0x101   :  { %2435 = vmatpush2.bf16.msra.mxu1 %v3664_v35 }
 0x102   :  { %2477 = vmatprep.subr.bf16.mxu1 %v3669_v51 }
 0x104   :  { %3270 = vmatmul.mubr.msk.bf16.gmra.mxu0 %vm261_vm0, %v257_v36 }
 0x105   :  { %1661 = vmatprep.mubr.bf16.mxu0 %v4820_v32 }
 0x10c   :  { %1662 = vmatmul.mubr.bf16.gmra.mxu0 %v3170_v47 }
 0x10d   :  { %1671 = vmatprep.mubr.bf16.mxu0 %v4820_v32 }
 0x114   :  { %1672 = vmatmul.mubr.bf16.gmra.mxu0 %v762_v57 }
 0x115   :  { %2582 = vmatprep.mubr.bf16.mxu0 %v4820_v32 }
 0x11c   :  { %v4323_v6 = vpop.f32.mrf.mxu0 }
 0x11d   :  { %v4325_v7 = vpop.f32.mrf.mxu1 }
 0x11e   :  { %v4327_v9 = vpop.f32.mrf.mxu0 }
 0x11f   :  { %v4329_v10 = vpop.f32.mrf.mxu1 }
 0x120   :  { %v4331_v14 = vpop.f32.mrf.mxu0 }
 0x121   :  { %v4333_v16 = vpop.f32.mrf.mxu1 }
 0x122   :  { %v4335_v17 = vpop.f32.mrf.mxu0 }
 0x123   :  { %v4339_v23 = vpop.f32.mrf.mxu1 }
 0x124   :  { %v4337_v21 = vpop.f32.mrf.mxu0 }
 0x125   :  { %v4345_v30 = vpop.f32.mrf.mxu1 }
 0x126   :  { %v4341_v24 = vpop.f32.mrf.mxu0 }
 0x127   :  { %v4351_v37 = vpop.f32.mrf.mxu1 }
 0x128   :  { %v4343_v28 = vpop.f32.mrf.mxu0 }
 0x129   :  { %v4357_v40 = vpop.f32.mrf.mxu1 }
 0x12a   :  { %v4347_v31 = vpop.f32.mrf.mxu0 }
 0x12b   :  { %v4363_v43 = vpop.f32.mrf.mxu1 }
 0x12c   :  { %v4349_v36 = vpop.f32.mrf.mxu0 }
 0x12d   :  { %v4369_v46 = vpop.f32.mrf.mxu1 }
 0x12e   :  { %v4353_v38 = vpop.f32.mrf.mxu0 }
 0x12f   :  { %v4375_v49 = vpop.f32.mrf.mxu1 }
 0x130   :  { %v4355_v39 = vpop.f32.mrf.mxu0 }
 0x131   :  { %v4381_v53 = vpop.f32.mrf.mxu1 }
 0x132   :  { %v4359_v41 = vpop.f32.mrf.mxu0 }
 0x133   :  { %v4387_v56 = vpop.f32.mrf.mxu1 }
 0x134   :  { %v4361_v42 = vpop.f32.mrf.mxu0 }
 0x135   :  { %v4393_v59 = vpop.f32.mrf.mxu1 }
 0x136   :  { %v4365_v44 = vpop.f32.mrf.mxu0 }
 0x137   :  { %v4399_v62 = vpop.f32.mrf.mxu1 }
 0x138   :  { %v4367_v45 = vpop.f32.mrf.mxu0 }
 0x139   :  { %v4405_v1 = vpop.f32.mrf.mxu1 }
 0x13a   :  { %v4371_v47 = vpop.f32.mrf.mxu0 }
 0x13b   :  { %v4411_v4 = vpop.f32.mrf.mxu1 }
 0x13c   :  { %v4373_v48 = vpop.f32.mrf.mxu0 }
 0x13d   :  { %v4417_v11 = vpop.f32.mrf.mxu1 }
 0x13e   :  { %v4377_v50 = vpop.f32.mrf.mxu0 }
 0x13f   :  { %v4423_v15 = vpop.f32.mrf.mxu1 }
 0x140   :  { %v4379_v52 = vpop.f32.mrf.mxu0 }
 0x141   :  { %v4429_v20 = vpop.f32.mrf.mxu1 }
 0x142   :  { %v4383_v54 = vpop.f32.mrf.mxu0 }
 0x143   :  { %v4435_v26 = vpop.f32.mrf.mxu1 }
 0x144   :  { %v4385_v55 = vpop.f32.mrf.mxu0 }
 0x145   :  { %v4441_v33 = vpop.f32.mrf.mxu1 }
 0x146   :  { %v4389_v57 = vpop.f32.mrf.mxu0 }
 0x147   :  { %v4447_v51 = vpop.f32.mrf.mxu1 }
 0x148   :  { %v4391_v58 = vpop.f32.mrf.mxu0 }
 0x14a   :  { %v4395_v60 = vpop.f32.mrf.mxu0 }
 0x14c   :  { %v4397_v61 = vpop.f32.mrf.mxu0 }
 0x14e   :  { %v4401_v63 = vpop.f32.mrf.mxu0 }
 0x150   :  { %v4403_v0 = vpop.f32.mrf.mxu0 }
 0x151   :  { %4822 = vst [vmem:[#allocation12_spill] sm:$0xff] %v4403_v0 }
 0x152   :  { %v4407_v2 = vpop.f32.mrf.mxu0 }
 0x153   :  { %4823 = vst [vmem:[#allocation13_spill] sm:$0xff] %v4407_v2 }
 0x154   :  { %v4409_v3 = vpop.f32.mrf.mxu0 }
 0x155   :  { %4824 = vst [vmem:[#allocation14_spill] sm:$0xff] %v4409_v3 }
 0x156   :  { %v4413_v5 = vpop.f32.mrf.mxu0 }
 0x157   :  { %4825 = vst [vmem:[#allocation15_spill] sm:$0xff] %v4413_v5 }
 0x158   :  { %v4415_v8 = vpop.f32.mrf.mxu0 }
 0x159   :  { %4826 = vst [vmem:[#allocation16_spill] sm:$0xff] %v4415_v8 }
 0x15a   :  { %v4419_v12 = vpop.f32.mrf.mxu0 }
 0x15b   :  { %4827 = vst [vmem:[#allocation17_spill] sm:$0xff] %v4419_v12 }
 0x15c   :  { %v4421_v13 = vpop.f32.mrf.mxu0 }
 0x15d   :  { %4828 = vst [vmem:[#allocation18_spill] sm:$0xff] %v4421_v13 }
 0x15e   :  { %v4425_v18 = vpop.f32.mrf.mxu0 }
 0x15f   :  { %4829 = vst [vmem:[#allocation19_spill] sm:$0xff] %v4425_v18 }
 0x160   :  { %v4427_v19 = vpop.f32.mrf.mxu0 }
 0x161   :  { %4830 = vst [vmem:[#allocation20_spill] sm:$0xff] %v4427_v19 }
 0x162   :  { %v4431_v22 = vpop.f32.mrf.mxu0 }
 0x163   :  { %4831 = vst [vmem:[#allocation21_spill] sm:$0xff] %v4431_v22  ;;  %v4453_v22 = vpop.f32.mrf.mxu1 }
 0x164   :  { %v4433_v25 = vpop.f32.mrf.mxu0 }
 0x165   :  { %4832 = vst [vmem:[#allocation22_spill] sm:$0xff] %v4433_v25 }
 0x166   :  { %v4437_v27 = vpop.f32.mrf.mxu0 }
 0x167   :  { %4833 = vst [vmem:[#allocation23_spill] sm:$0xff] %v4437_v27  ;;  %v4459_v27 = vpop.f32.mrf.mxu1 }
 0x168   :  { %v4439_v29 = vpop.f32.mrf.mxu0 }
 0x169   :  { %4834 = vst [vmem:[#allocation24_spill] sm:$0xff] %v4439_v29 }
 0x16a   :  { %v4443_v34 = vpop.f32.mrf.mxu0 }
 0x16b   :  { %4835 = vst [vmem:[#allocation25_spill] sm:$0xff] %v4443_v34  ;;  %v4465_v34 = vpop.f32.mrf.mxu1 }
 0x16c   :  { %v4445_v35 = vpop.f32.mrf.mxu0 }
 0x16d   :  { %4836 = vst [vmem:[#allocation26_spill] sm:$0xff] %v4445_v35 }
 0x16e   :  { %v4449_v32 = vpop.f32.mrf.mxu0 }
 0x16f   :  { %4837 = vst [vmem:[#allocation27_spill] sm:$0xff] %v4449_v32  ;;  %v1413_v32 = vadd.f32 %v4329_v10, %v4327_v9  ;;  %v1421_v10 = vadd.f32 %v4345_v30, %v4337_v21 }
 0x170   :  { %v4451_v19 = vpop.f32.mrf.mxu0 }
 0x171   :  { %4838 = vst [vmem:[#allocation28_spill] sm:$0xff] %v4451_v19  ;;  %v1411_v19 = vadd.f32 %v4325_v7, %v4323_v6 }
 0x172   :  { %v4455_v25 = vpop.f32.mrf.mxu0 }
 0x173   :  { %4839 = vst [vmem:[#allocation29_spill] sm:$0xff] %v4455_v25  ;;  %v4473_v25 = vpop.f32.mrf.mxu1 }
 0x174   :  { %v4457_v18 = vpop.f32.mrf.mxu0 }
 0x175   :  { %4840 = vst [vmem:[#allocation30_spill] sm:$0xff] %v4457_v18  ;;  %v4479_v2 = vpop.f32.mrf.mxu1 }
 0x176   :  { %v4461_v29 = vpop.f32.mrf.mxu0 }
 0x177   :  { %4841 = vst [vmem:[#allocation31_spill] sm:$0xff] %v4461_v29  ;;  %v1417_v29 = vadd.f32 %v4339_v23, %v4335_v17 }
 0x178   :  { %v4463_v13 = vpop.f32.mrf.mxu0 }
 0x179   :  { %4842 = vst [vmem:[#allocation32_spill] sm:$0xff] %v4463_v13  ;;  %v1415_v13 = vadd.f32 %v4333_v16, %v4331_v14 }
 0x17a   :  { %v4467_v35 = vpop.f32.mrf.mxu0 }
 0x17b   :  { %4843 = vst [vmem:[#allocation33_spill] sm:$0xff] %v4467_v35 }
 0x17c   :  { %v1563_v12 = vpop.f32.mrf.mxu0 }
 0x17d   :  { %v1564_v8 = vadd.f32 %v1563_v12, %v1411_v19  ;;  %v1433_v19 = vadd.f32 %v4375_v49, %v4353_v38  ;;  %v1437_v38 = vadd.f32 %v4387_v56, %v4359_v41  ;;  %v1443_v41 = vadd.f32 %v4399_v62, %v4365_v44 }
 0x17e   :  { %v1565_v18 = vpop.f32.mrf.mxu0  ;;  %v1447_v44 = vadd.f32 %v4411_v4, %v4371_v47 }
 0x17f   :  { %v1566_v5 = vadd.f32 %v1565_v18, %v1413_v32  ;;  %v1423_v32 = vadd.f32 %v4351_v37, %v4341_v24  ;;  %v4485_v18 = vpop.f32.mrf.mxu1 }
 0x180   :  { %v1567_v3 = vpop.f32.mrf.mxu0 }
 0x181   :  { %v1682_v35 = vmax.f32 %v1564_v8, %v1566_v5  ;;  %v1568_v6 = vadd.f32 %v1567_v3, %v1415_v13  ;;  %v1425_v5 = vadd.f32 %v4357_v40, %v4343_v28  ;;  %v4491_v8 = vpop.f32.mrf.mxu1  ;;  %v1431_v13 = vadd.f32 %v4369_v46, %v4349_v36 }
 0x182   :  { %v1569_v0 = vpop.f32.mrf.mxu0  ;;  %v1435_v36 = vadd.f32 %v4381_v53, %v4355_v39  ;;  %v1441_v39 = vadd.f32 %v4393_v59, %v4361_v42  ;;  %v1445_v42 = vadd.f32 %v4405_v1, %v4367_v45  ;;  %v1453_v45 = vadd.f32 %v4423_v15, %v4377_v50 }
 0x183   :  { %1706 = vst [vmem:[#allocation2] sm:$0xff] %v1682_v35  ;;  %v1570_v7 = vadd.f32 %v1569_v0, %v1417_v29  ;;  %v1427_v0 = vadd.f32 %v4363_v43, %v4347_v31  ;;  %v4497_v35 = vpop.f32.mrf.mxu1  ;;  %v4502_v43 = vld [vmem:[%s4812_s2] ss:$0 sm:$0xff]  ;;  %v1457_v50 = vadd.f32 %v4435_v26, %v4383_v54 }
 0x184   :  { %v1573_v9 = vpop.f32.mrf.mxu0 }
 0x185   :  { %v1683_v12 = vmax.f32 %v1568_v6, %v1570_v7  ;;  %v1574_v16 = vadd.f32 %v1573_v9, %v1421_v10 }
 0x186   :  { %v1575_v14 = vpop.f32.mrf.mxu0 }
 0x187   :  { %1707 = vst [vmem:[#allocation2 + $0x8] sm:$0xff] %v1683_v12  ;;  %v1576_v17 = vadd.f32 %v1575_v14, %v1423_v32  ;;  %v4511_v32 = vpop.f32.mrf.mxu1 }
 0x188   :  { %v1577_v23 = vpop.f32.mrf.mxu0 }
 0x189   :  { %v1684_v3 = vmax.f32 %v1574_v16, %v1576_v17  ;;  %v1578_v24 = vadd.f32 %v1577_v23, %v1425_v5 }
 0x18a   :  { %v1579_v21 = vpop.f32.mrf.mxu0 }
 0x18b   :  { %1708 = vst [vmem:[#allocation2 + $0x10] sm:$0xff] %v1684_v3  ;;  %v1580_v30 = vadd.f32 %v1579_v21, %v1427_v0  ;;  %v4521_v21 = vpop.f32.mrf.mxu1 }
 0x18c   :  { %v1583_v37 = vpop.f32.mrf.mxu0 }
 0x18d   :  { %v1685_v29 = vmax.f32 %v1578_v24, %v1580_v30  ;;  %v1584_v7 = vadd.f32 %v1583_v37, %v1431_v13  ;;  %v4527_v62 = vpop.f32.mrf.mxu1 }
 0x18e   :  { %v1730_v28 = vld [vmem:[#allocation2] ss:$2 sm:$0xff]  ;;  %v1762_v40 = vld [vmem:[#allocation2 + $0x1] ss:$2 sm:$0xff]  ;;  %v1585_v31 = vpop.f32.mrf.mxu0 }
 0x18f   :  { %v1793_v6 = vmax.f32 %v1730_v28, %v1762_v40  ;;  %1709 = vst [vmem:[#allocation2 + $0x18] sm:$0xff] %v1685_v29  ;;  %v1586_v9 = vadd.f32 %v1585_v31, %v1433_v19  ;;  %v4536_v4 = vpop.f32.mrf.mxu1 }
 0x190   :  { %v1587_v10 = vpop.f32.mrf.mxu0 }
 0x191   :  { %v1686_v46 = vmax.f32 %v1584_v7, %v1586_v9  ;;  %v4509_v49 = vadd.f32 %v4502_v43, %v1793_v6  ;;  %v1588_v23 = vadd.f32 %v1587_v10, %v1435_v36  ;;  %v1451_v10 = vadd.f32 %v4417_v11, %v4373_v48 }
 0x192   :  { %v1732_v12 = vld [vmem:[#allocation2 + $0x10] ss:$2 sm:$0xf]  ;;  %v1764_v14 = vld [vmem:[#allocation2 + $0x11] ss:$2 sm:$0xf]  ;;  %v1589_v16 = vpop.f32.mrf.mxu0  ;;  %v1455_v48 = vadd.f32 %v4429_v20, %v4379_v52  ;;  %v1463_v52 = vadd.f32 %v4447_v51, %v4389_v57 }
 0x193   :  { %v1794_v17 = vmax.f32 %v1732_v12, %v1764_v14  ;;  %1710 = vst [vmem:[#allocation2 + $0x20] sm:$0xff] %v1686_v46  ;;  %v1590_v5 = vadd.f32 %v1589_v16, %v1437_v38  ;;  %v1832_v0 = vmax.f32 %v4509_v49, 0.0 }
 0x194   :  { %v1593_v3 = vpop.f32.mrf.mxu0 }
 0x195   :  { %v1687_v53 = vmax.f32 %v1588_v23, %v1590_v5  ;;  %v1817_v56 = vadd.f32 %v4502_v43, %v1794_v17  ;;  %1848 = vst [vmem:[#allocation3] sm:$0xff] %v1832_v0  ;;  %v1594_v30 = vadd.f32 %v1593_v3, %v1441_v39  ;;  %v4544_v5 = vpop.f32.mrf.mxu1 }
 0x196   :  { %v1595_v24 = vpop.f32.mrf.mxu0 }
 0x197   :  { %1711 = vst [vmem:[#allocation2 + $0x28] sm:$0xff] %v1687_v53  ;;  %v1596_v37 = vadd.f32 %v1595_v24, %v1443_v41  ;;  %v1833_v13 = vmax.f32 %v1817_v56, 0.0  ;;  %v1461_v24 = vadd.f32 %v4441_v33, %v4385_v55  ;;  %v4550_v54 = vpop.f32.mrf.mxu1  ;;  %v1467_v55 = vadd.f32 %v4459_v27, %v4395_v60 }
 0x198   :  { %v1597_v19 = vpop.f32.mrf.mxu0 }
 0x199   :  { %v1688_v59 = vmax.f32 %v1594_v30, %v1596_v37  ;;  %1849 = vst [vmem:[#allocation3 + $0x8] sm:$0xf] %v1833_v13  ;;  %v1598_v6 = vadd.f32 %v1597_v19, %v1445_v42  ;;  %v4559_v51 = vpop.f32.mrf.mxu1 }
 0x19a   :  { %v1734_v29 = vld [vmem:[#allocation2 + $0x18] ss:$2 sm:$0xff]  ;;  %v1766_v28 = vld [vmem:[#allocation2 + $0x19] ss:$2 sm:$0xff]  ;;  %v1599_v40 = vpop.f32.mrf.mxu0 }
 0x19b   :  { %v1795_v31 = vmax.f32 %v1734_v29, %v1766_v28  ;;  %1712 = vst [vmem:[#allocation2 + $0x30] sm:$0xff] %v1688_v59  ;;  %v1600_v7 = vadd.f32 %v1599_v40, %v1447_v44  ;;  %v1465_v59 = vadd.f32 %v4453_v22, %v4391_v58  ;;  %v1471_v58 = vadd.f32 %v4465_v34, %v4397_v61  ;;  %v3672_v34 = vld [vmem:[#allocation8 + $0x164] ss:$8 sps:$4 sm:$0xff]  }
 0x19c   :  { %v1603_v9 = vpop.f32.mrf.mxu0 }
 0x19d   :  { %v1689_v1 = vmax.f32 %v1598_v6, %v1600_v7  ;;  %v4534_v47 = vadd.f32 %v4502_v43, %v1795_v31  ;;  %v1604_v14 = vadd.f32 %v1603_v9, %v1451_v10 }
 0x19e   :  { %v1736_v36 = vld [vmem:[#allocation2 + $0x28] ss:$2 sm:$0xf]  ;;  %v1768_v38 = vld [vmem:[#allocation2 + $0x29] ss:$2 sm:$0xf]  ;;  %v1605_v46 = vpop.f32.mrf.mxu0 }
 0x19f   :  { %v1796_v12 = vmax.f32 %v1736_v36, %v1768_v38  ;;  %1713 = vst [vmem:[#allocation2 + $0x38] sm:$0xff] %v1689_v1  ;;  %v1606_v16 = vadd.f32 %v1605_v46, %v1453_v45  ;;  %v1834_v17 = vmax.f32 %v4534_v47, 0.0  ;;  %v1473_v1 = vadd.f32 %v4473_v25, %v4401_v63  ;;  %v3667_v46 = vld [vmem:[#allocation8 + $0x170] ss:$8 sps:$4 sm:$0xff]  }
 0x1a0   :  { %v1607_v23 = vpop.f32.mrf.mxu0  ;;  %v1872_v9 = vld [vmem:[#allocation3 + $0x1] sm:$0xff]  ;;  %v4844_v25 = vmov 0  }
 0x1a1   :  { %v1690_v11 = vmax.f32 %v1604_v14, %v1606_v16  ;;  %v1819_v15 = vadd.f32 %v4502_v43, %v1796_v12  ;;  %1850 = vst [vmem:[#allocation3 + $0x10] sm:$0xff] %v1834_v17  ;;  %v1608_v39 = vadd.f32 %v1607_v23, %v1455_v48  ;;  %v1896_v27 = vld [vmem:[#allocation3 + $0x4] sm:$0xff]  ;;  %v4568_v12 = vpop.f32.mrf.mxu1  ;;  %v1904_v61 = vpack.c.bf16 %v1834_v17, %v1832_v0 }
 0x1a2   :  { %v1609_v3 = vpop.f32.mrf.mxu0  ;;  %v3670_v17 = vld [vmem:[#allocation8 + $0x160] ss:$8 sps:$4 sm:$0xff]  }
 0x1a3   :  { %1714 = vst [vmem:[#allocation2 + $0x40] sm:$0xff] %v1690_v11  ;;  %v1610_v41 = vadd.f32 %v1609_v3, %v1457_v50  ;;  %v1835_v53 = vmax.f32 %v1819_v15, 0.0  ;;  %v4845_v11 = vld [vmem:[#allocation12_spill] sm:$0xff]  ;;  %v4846_v3 = vld [vmem:[#allocation13_spill] sm:$0xff] }
 0x1a4   :  { %v1613_v56 = vpop.f32.mrf.mxu0  ;;  %v1475_v15 = vadd.f32 %v4479_v2, %v4845_v11  ;;  %v1477_v49 = vadd.f32 %v4485_v18, %v4846_v3  ;;  %v4847_v2 = vld [vmem:[#allocation14_spill] sm:$0xff]  ;;  %v4848_v18 = vld [vmem:[#allocation15_spill] sm:$0xff]  ;;  %v3684_v3 = vld [vmem:[#allocation8 + $0x124] ss:$8 sps:$4 sm:$0xff]  }
 0x1a5   :  { %v1691_v20 = vmax.f32 %v1608_v39, %v1610_v41  ;;  %1851 = vst [vmem:[#allocation3 + $0x18] sm:$0xf] %v1835_v53  ;;  %v1614_v19 = vadd.f32 %v1613_v56, %v1461_v24  ;;  %v4578_v39 = vpop.f32.mrf.mxu1  ;;  %v3675_v24 = vld [vmem:[#allocation8 + $0x154] ss:$8 sps:$4 sm:$0xff]  }
 0x1a6   :  { %v1738_v26 = vld [vmem:[#allocation2 + $0x30] ss:$2 sm:$0xff]  ;;  %v1770_v30 = vld [vmem:[#allocation2 + $0x31] ss:$2 sm:$0xff]  ;;  %v1615_v37 = vpop.f32.mrf.mxu0 }
 0x1a7   :  { %v1797_v13 = vmax.f32 %v1738_v26, %v1770_v30  ;;  %1715 = vst [vmem:[#allocation2 + $0x48] sm:$0xff] %v1691_v20  ;;  %v1616_v42 = vadd.f32 %v1615_v37, %v1463_v52  ;;  %v1481_v37 = vadd.f32 %v4491_v8, %v4847_v2 }
 0x1a8   :  { %v1617_v44 = vpop.f32.mrf.mxu0 }
 0x1a9   :  { %v1692_v33 = vmax.f32 %v1614_v19, %v1616_v42  ;;  %v4557_v57 = vadd.f32 %v4502_v43, %v1797_v13  ;;  %v1618_v6 = vadd.f32 %v1617_v44, %v1465_v59  ;;  %v1483_v13 = vadd.f32 %v4497_v35, %v4848_v18  ;;  %v3673_v44 = vld [vmem:[#allocation8 + $0x150] ss:$8 sps:$4 sm:$0xff]   ;;  %v3678_v59 = vld [vmem:[#allocation8 + $0x144] ss:$8 sps:$4 sm:$0xff]  }
 0x1aa   :  { %v1740_v29 = vld [vmem:[#allocation2 + $0x40] ss:$2 sm:$0xf]  ;;  %v1772_v28 = vld [vmem:[#allocation2 + $0x41] ss:$2 sm:$0xf]  ;;  %v1619_v40 = vpop.f32.mrf.mxu0 }
 0x1ab   :  { %v1798_v31 = vmax.f32 %v1740_v29, %v1772_v28  ;;  %1716 = vst [vmem:[#allocation2 + $0x50] sm:$0xff] %v1692_v33  ;;  %v1620_v7 = vadd.f32 %v1619_v40, %v1467_v55  ;;  %v1836_v10 = vmax.f32 %v4557_v57, 0.0  ;;  %v4587_v55 = vpop.f32.mrf.mxu1 }
 0x1ac   :  { %v1623_v60 = vpop.f32.mrf.mxu0  ;;  %v1873_v22 = vld [vmem:[#allocation3 + $0x11] sm:$0xff] }
 0x1ad   :  { %v1897_v45 = vld [vmem:[#allocation3 + $0x14] sm:$0xff]  ;;  %v1693_v47 = vmax.f32 %v1618_v6, %v1620_v7  ;;  %v1905_v36 = vpack.c.bf16 %v1873_v22, %v1872_v9  ;;  %1852 = vst [vmem:[#allocation3 + $0x20] sm:$0xff] %v1836_v10  ;;  %v1821_v16 = vadd.f32 %v4502_v43, %v1798_v31  ;;  %v1624_v23 = vadd.f32 %v1623_v60, %v1471_v58  ;;  %v4849_v7 = vld [vmem:[#allocation16_spill] sm:$0xff]  ;;  %v4850_v58 = vld [vmem:[#allocation17_spill] sm:$0xff] }
 0x1ae   :  { %v1908_v38 = vpack.c.bf16 %v1897_v45, %v1896_v27  ;;  %v1625_v14 = vpop.f32.mrf.mxu0  ;;  %v1485_v9 = vadd.f32 %v4511_v32, %v4849_v7  ;;  %v1487_v60 = vadd.f32 %v4521_v21, %v4850_v58  ;;  %v3676_v45 = vld [vmem:[#allocation8 + $0x140] ss:$8 sps:$4 sm:$0xff]  }
 0x1af   :  { %1717 = vst [vmem:[#allocation2 + $0x58] sm:$0xff] %v1693_v47  ;;  %v1626_v48 = vadd.f32 %v1625_v14, %v1473_v1  ;;  %2436 = vmatprep.mubr.bf16.mxu1 %v1905_v36  ;;  %v1837_v50 = vmax.f32 %v1821_v16, 0.0  ;;  %v4597_v1 = vpop.f32.mrf.mxu1  ;;  %v3681_v36 = vld [vmem:[#allocation8 + $0x134] ss:$8 sps:$4 sm:$0xff]  }
 0x1b0   :  { %2583 = vmatmul.mubr.bf16.vlgmr.msra.gmra.mxu0 %v1908_v38  ;;  %v1627_v63 = vpop.f32.mrf.mxu0  ;;  %2437 = vmatmul.mubr.bf16.vlgmr.msra.gmra.mxu1 %v1904_v61  ;;  %v4851_v61 = vld [vmem:[#allocation18_spill] sm:$0xff] }
 0x1b1   :  { %2592 = vmatprep.mubr.bf16.mxu0 %v4844_v25  ;;  %v1694_v0 = vmax.f32 %v1624_v23, %v1626_v48  ;;  %2478 = vmatpush1.bf16.msra.mxu1 %v3667_v46  ;;  %1853 = vst [vmem:[#allocation3 + $0x28] sm:$0xf] %v1837_v50  ;;  %v1628_v20 = vadd.f32 %v1627_v63, %v1475_v15  ;;  %v3679_v48 = vld [vmem:[#allocation8 + $0x130] ss:$8 sps:$4 sm:$0xff]   ;;  %v4603_v63 = vpop.f32.mrf.mxu1 }
 0x1b2   :  { %v1742_v41 = vld [vmem:[#allocation2 + $0x48] ss:$2 sm:$0xff]  ;;  %v1774_v53 = vld [vmem:[#allocation2 + $0x49] ss:$2 sm:$0xff]  ;;  %v1629_v56 = vpop.f32.mrf.mxu0  ;;  %2479 = vmatprep.subr.bf16.mxu1 %v3672_v34  ;;  %v1491_v21 = vadd.f32 %v4527_v62, %v4851_v61  ;;  %v4852_v34 = vld [vmem:[#allocation19_spill] sm:$0xff] }
 0x1b3   :  { %v1799_v52 = vmax.f32 %v1742_v41, %v1774_v53  ;;  %1718 = vst [vmem:[#allocation2 + $0x60] sm:$0xff] %v1694_v0  ;;  %v1630_v26 = vadd.f32 %v1629_v56, %v1477_v49  ;;  %v1493_v16 = vadd.f32 %v4536_v4, %v4852_v34  ;;  %v4853_v62 = vld [vmem:[#allocation20_spill] sm:$0xff]  ;;  %v4854_v4 = vld [vmem:[#allocation21_spill] sm:$0xff] }
 0x1b4   :  { %v1633_v30 = vpop.f32.mrf.mxu0  ;;  %v1495_v53 = vadd.f32 %v4544_v5, %v4853_v62  ;;  %v1497_v56 = vadd.f32 %v4550_v54, %v4854_v4  ;;  %v3696_v62 = vld [vmem:[#allocation8 + $0x1e4] ss:$8 sps:$4 sm:$0xff]  }
 0x1b5   :  { %v1695_v19 = vmax.f32 %v1628_v20, %v1630_v26  ;;  %2480 = vmatpush1.bf16.msra.mxu1 %v3670_v17  ;;  %v4585_v42 = vadd.f32 %v4502_v43, %v1799_v52  ;;  %v1634_v31 = vadd.f32 %v1633_v30, %v1481_v37  ;;  %v3682_v52 = vld [vmem:[#allocation8 + $0x120] ss:$8 sps:$4 sm:$0xff]   ;;  %v3687_v20 = vld [vmem:[#allocation8 + $0x114] ss:$8 sps:$4 sm:$0xff]   ;;  %v4612_v30 = vpop.f32.mrf.mxu1 }
 0x1b6   :  { %v1744_v33 = vld [vmem:[#allocation2 + $0x58] ss:$2 sm:$0xf]  ;;  %v1776_v29 = vld [vmem:[#allocation2 + $0x59] ss:$2 sm:$0xf]  ;;  %v1635_v28 = vpop.f32.mrf.mxu0  ;;  %2481 = vmatprep.subr.bf16.mxu1 %v3675_v24 }
 0x1b7   :  { %v1800_v40 = vmax.f32 %v1744_v33, %v1776_v29  ;;  %1719 = vst [vmem:[#allocation2 + $0x68] sm:$0xff] %v1695_v19  ;;  %v1636_v8 = vadd.f32 %v1635_v28, %v1483_v13  ;;  %v1838_v6 = vmax.f32 %v4585_v42, 0.0 }
 0x1b8   :  { %v1637_v35 = vpop.f32.mrf.mxu0 }
 0x1b9   :  { %v1696_v22 = vmax.f32 %v1634_v31, %v1636_v8  ;;  %v1823_v27 = vadd.f32 %v4502_v43, %v1800_v40  ;;  %1854 = vst [vmem:[#allocation3 + $0x30] sm:$0xff] %v1838_v6  ;;  %2482 = vmatpush1.bf16.msra.mxu1 %v3673_v44  ;;  %v1638_v38 = vadd.f32 %v1637_v35, %v1485_v9  ;;  %v1874_v44 = vld [vmem:[#allocation3 + $0x21] sm:$0xff]  ;;  %v4856_v8 = vld [vmem:[#allocation23_spill] sm:$0xff] }
 0x1ba   :  { %v1639_v47 = vpop.f32.mrf.mxu0  ;;  %2483 = vmatprep.subr.bf16.mxu1 %v3678_v59  ;;  %v4855_v59 = vld [vmem:[#allocation22_spill] sm:$0xff]  ;;  %v1898_v40 = vld [vmem:[#allocation3 + $0x24] sm:$0xff]  ;;  %v1503_v35 = vadd.f32 %v4568_v12, %v4856_v8 }
 0x1bb   :  { %1720 = vst [vmem:[#allocation2 + $0x70] sm:$0xff] %v1696_v22  ;;  %v1640_v46 = vadd.f32 %v1639_v47, %v1487_v60  ;;  %v1839_v32 = vmax.f32 %v1823_v27, 0.0  ;;  %v1501_v33 = vadd.f32 %v4559_v51, %v4855_v59  ;;  %v3685_v60 = vld [vmem:[#allocation8 + $0x110] ss:$8 sps:$4 sm:$0xff]   ;;  %v1516_v22 = vpop.f32.mrf.mxu1  ;;  %v1909_v51 = vpack.c.bf16 %v1838_v6, %v1836_v10  ;;  %v3688_v6 = vld [vmem:[#allocation8 + $0x100] ss:$8 sps:$4 sm:$0xff]  }
 0x1bc   :  { %v1643_v14 = vpop.f32.mrf.mxu0  ;;  %v3694_v59 = vld [vmem:[#allocation8 + $0x1e0] ss:$8 sps:$4 sm:$0xff]  }
 0x1bd   :  { %v1697_v23 = vmax.f32 %v1638_v38, %v1640_v46  ;;  %1855 = vst [vmem:[#allocation3 + $0x38] sm:$0xf] %v1839_v32  ;;  %2484 = vmatpush1.bf16.msra.mxu1 %v3676_v45  ;;  %v1644_v0 = vadd.f32 %v1643_v14, %v1491_v21  ;;  %v3690_v45 = vld [vmem:[#allocation8 + $0x104] ss:$8 sps:$4 sm:$0xff]   ;;  %v1520_v61 = vpop.f32.mrf.mxu1 }
 0x1be   :  { %v1746_v50 = vld [vmem:[#allocation2 + $0x60] ss:$2 sm:$0xff]  ;;  %v1778_v11 = vld [vmem:[#allocation2 + $0x61] ss:$2 sm:$0xff]  ;;  %v1645_v15 = vpop.f32.mrf.mxu0  ;;  %2485 = vmatprep.subr.bf16.mxu1 %v3681_v36 }
 0x1bf   :  { %v1801_v49 = vmax.f32 %v1746_v50, %v1778_v11  ;;  %1721 = vst [vmem:[#allocation2 + $0x78] sm:$0xff] %v1697_v23  ;;  %v1646_v17 = vadd.f32 %v1645_v15, %v1493_v16  ;;  %v4857_v32 = vld [vmem:[#allocation24_spill] sm:$0xff]  ;;  %v4858_v14 = vld [vmem:[#allocation25_spill] sm:$0xff]  ;;  %v3693_v23 = vld [vmem:[#allocation8 + $0x1f4] ss:$8 sps:$4 sm:$0xff]  }
 0x1c0   :  { %v1647_v41 = vpop.f32.mrf.mxu0  ;;  %v1505_v57 = vadd.f32 %v4578_v39, %v4857_v32  ;;  %v1507_v10 = vadd.f32 %v4587_v55, %v4858_v14 }
 0x1c1   :  { %v1698_v24 = vmax.f32 %v1644_v0, %v1646_v17  ;;  %2486 = vmatpush1.bf16.msra.mxu1 %v3679_v48  ;;  %v4610_v26 = vadd.f32 %v4502_v43, %v1801_v49  ;;  %v1648_v19 = vadd.f32 %v1647_v41, %v1495_v53  ;;  %v4860_v49 = vld [vmem:[#allocation27_spill] sm:$0xff]  ;;  %v1522_v53 = vpop.f32.mrf.mxu1 }
 0x1c2   :  { %v1748_v2 = vld [vmem:[#allocation2 + $0x70] ss:$2 sm:$0xf]  ;;  %v1780_v37 = vld [vmem:[#allocation2 + $0x71] ss:$2 sm:$0xf]  ;;  %v1649_v18 = vpop.f32.mrf.mxu0  ;;  %2487 = vmatprep.subr.bf16.mxu1 %v3684_v3  ;;  %v1513_v55 = vadd.f32 %v4603_v63, %v4860_v49 }
 0x1c3   :  { %v1802_v13 = vmax.f32 %v1748_v2, %v1780_v37  ;;  %1722 = vst [vmem:[#allocation2 + $0x80] sm:$0xff] %v1698_v24  ;;  %v1650_v5 = vadd.f32 %v1649_v18, %v1497_v56  ;;  %v1840_v54 = vmax.f32 %v4610_v26, 0.0  ;;  %v4859_v3 = vld [vmem:[#allocation26_spill] sm:$0xff]  ;;  %v4861_v63 = vld [vmem:[#allocation28_spill] sm:$0xff] }
 0x1c4   :  { %v1653_v29 = vpop.f32.mrf.mxu0  ;;  %v1875_v28 = vld [vmem:[#allocation3 + $0x31] sm:$0xff]  ;;  %v1511_v39 = vadd.f32 %v4597_v1, %v4859_v3  ;;  %v1515_v18 = vadd.f32 %v4612_v30, %v4861_v63 }
 0x1c5   :  { %v1899_v31 = vld [vmem:[#allocation3 + $0x34] sm:$0xff]  ;;  %v1699_v7 = vmax.f32 %v1648_v19, %v1650_v5  ;;  %v1910_v9 = vpack.c.bf16 %v1875_v28, %v1874_v44  ;;  %2488 = vmatpush1.bf16.msra.mxu1 %v3682_v52  ;;  %1856 = vst [vmem:[#allocation3 + $0x40] sm:$0xff] %v1840_v54  ;;  %v1825_v47 = vadd.f32 %v4502_v43, %v1802_v13  ;;  %v4862_v13 = vld [vmem:[#allocation29_spill] sm:$0xff] }
 0x1c6   :  { %v1913_v58 = vpack.c.bf16 %v1899_v31, %v1898_v40  ;;  %v1655_v27 = vpop.f32.mrf.mxu0  ;;  %2489 = vmatprep.subr.bf16.mxu1 %v3687_v20  ;;  %v1654_v12 = vadd.f32 %v1653_v29, %v1501_v33  ;;  %v3691_v41 = vld [vmem:[#allocation8 + $0x1f0] ss:$8 sps:$4 sm:$0xff]   ;;  %v1517_v19 = vadd.f32 %v1516_v22, %v4862_v13  ;;  %v1524_v33 = vpop.f32.mrf.mxu1  ;;  %v3699_v28 = vld [vmem:[#allocation8 + $0x1d4] ss:$8 sps:$4 sm:$0xff]  }
 0x1c7   :  { %1723 = vst [vmem:[#allocation2 + $0x88] sm:$0xff] %v1699_v7  ;;  %v1656_v36 = vadd.f32 %v1655_v27, %v1503_v35  ;;  %2446 = vmatprep.mubr.bf16.mxu1 %v1910_v9  ;;  %v1841_v46 = vmax.f32 %v1825_v47, 0.0  ;;  %v4863_v7 = vld [vmem:[#allocation30_spill] sm:$0xff]  ;;  %v4864_v30 = vld [vmem:[#allocation31_spill] sm:$0xff] }
 0x1c8   :  { %2593 = vmatmul.mubr.bf16.gmra.mxu0 %v1913_v58  ;;  %v1657_v38 = vpop.f32.mrf.mxu0  ;;  %2447 = vmatmul.mubr.bf16.gmra.mxu1 %v1909_v51  ;;  %v1521_v9 = vadd.f32 %v1520_v61, %v4863_v7  ;;  %v1523_v58 = vadd.f32 %v1522_v53, %v4864_v30  ;;  %v3697_v22 = vld [vmem:[#allocation8 + $0x1d0] ss:$8 sps:$4 sm:$0xff]   ;;  %v1526_v27 = vpop.f32.mrf.mxu1  ;;  %v3700_v61 = vld [vmem:[#allocation8 + $0x1c0] ss:$8 sps:$4 sm:$0xff]   ;;  %v3711_v63 = vld [vmem:[#allocation8 + $0x194] ss:$8 sps:$4 sm:$0xff]  }
 0x1c9   :  { %2602 = vmatprep.mubr.bf16.mxu0 %v4844_v25  ;;  %v1700_v42 = vmax.f32 %v1654_v12, %v1656_v36  ;;  %2490 = vmatpush1.bf16.msra.mxu1 %v3685_v60  ;;  %1857 = vst [vmem:[#allocation3 + $0x48] sm:$0xf] %v1841_v46  ;;  %v1658_v50 = vadd.f32 %v1657_v38, %v1505_v57  ;;  %v3702_v12 = vld [vmem:[#allocation8 + $0x1c4] ss:$8 sps:$4 sm:$0xff]   ;;  %v3703_v53 = vld [vmem:[#allocation8 + $0x1b0] ss:$8 sps:$4 sm:$0xff]  }
 0x1ca   :  { %v1750_v21 = vld [vmem:[#allocation2 + $0x78] ss:$2 sm:$0xff]  ;;  %v1782_v34 = vld [vmem:[#allocation2 + $0x79] ss:$2 sm:$0xff]  ;;  %v1659_v16 = vpop.f32.mrf.mxu0  ;;  %2491 = vmatprep.subr.bf16.mxu1 %v3690_v45 }
 0x1cb   :  { %v1803_v48 = vmax.f32 %v1750_v21, %v1782_v34  ;;  %1724 = vst [vmem:[#allocation2 + $0x90] sm:$0xff] %v1700_v42  ;;  %v1660_v11 = vadd.f32 %v1659_v16, %v1507_v10  ;;  %v4865_v57 = vld [vmem:[#allocation32_spill] sm:$0xff]  ;;  %v4866_v10 = vld [vmem:[#allocation33_spill] sm:$0xff]  ;;  %v3705_v21 = vld [vmem:[#allocation8 + $0x1b4] ss:$8 sps:$4 sm:$0xff]  }
 0x1cc   :  { %v1663_v15 = vpop.f32.mrf.mxu0  ;;  %v1525_v14 = vadd.f32 %v1524_v33, %v4865_v57  ;;  %v1527_v42 = vadd.f32 %v1526_v27, %v4866_v10  ;;  %v1888_v30 = vld [vmem:[#allocation3 + $0x3] sm:$0xff] }
 0x1cd   :  { %v1701_v0 = vmax.f32 %v1658_v50, %v1660_v11  ;;  %2492 = vmatpush1.bf16.msra.mxu1 %v3688_v6  ;;  %v4636_v17 = vadd.f32 %v4502_v43, %v1803_v48  ;;  %v1664_v20 = vadd.f32 %v1663_v15, %v1511_v39 }
 0x1ce   :  { %v1752_v4 = vld [vmem:[#allocation2 + $0x88] ss:$2 sm:$0xf]  ;;  %v1784_v56 = vld [vmem:[#allocation2 + $0x89] ss:$2 sm:$0xf]  ;;  %v1665_v24 = vpop.f32.mrf.mxu0  ;;  %2493 = vmatprep.subr.bf16.mxu1 %v3693_v23 }
 0x1cf   :  { %v1804_v52 = vmax.f32 %v1752_v4, %v1784_v56  ;;  %1725 = vst [vmem:[#allocation2 + $0x98] sm:$0xff] %v1701_v0  ;;  %v1666_v2 = vadd.f32 %v1665_v24, %v1513_v55  ;;  %v1842_v1 = vmax.f32 %v4636_v17, 0.0  ;;  %v3708_v24 = vld [vmem:[#allocation8 + $0x1a4] ss:$8 sps:$4 sm:$0xff]  }
 0x1d0   :  { %v1667_v37 = vpop.f32.mrf.mxu0  ;;  %v1876_v3 = vld [vmem:[#allocation3 + $0x41] sm:$0xff] }
 0x1d1   :  { %v1702_v5 = vmax.f32 %v1664_v20, %v1666_v2  ;;  %v1827_v44 = vadd.f32 %v4502_v43, %v1804_v52  ;;  %1858 = vst [vmem:[#allocation3 + $0x50] sm:$0xff] %v1842_v1  ;;  %2494 = vmatpush2.bf16.msra.mxu1 %v3691_v41  ;;  %v1668_v40 = vadd.f32 %v1667_v37, %v1515_v18  ;;  %v1900_v55 = vld [vmem:[#allocation3 + $0x44] sm:$0xff] }
 0x1d2   :  { %v1669_v29 = vpop.f32.mrf.mxu0  ;;  %2495 = vmatprep.subr.bf16.mxu1 %v3696_v62  ;;  %v1914_v56 = vpack.c.bf16 %v1842_v1, %v1840_v54  ;;  %v3706_v20 = vld [vmem:[#allocation8 + $0x1a0] ss:$8 sps:$4 sm:$0xff]   ;;  %v3709_v54 = vld [vmem:[#allocation8 + $0x190] ss:$8 sps:$4 sm:$0xff]   ;;  %v3714_v1 = vld [vmem:[#allocation8 + $0x184] ss:$8 sps:$4 sm:$0xff]  }
 0x1d3   :  { %1726 = vst [vmem:[#allocation2 + $0xa0] sm:$0xff] %v1702_v5  ;;  %v1670_v31 = vadd.f32 %v1669_v29, %v1517_v19  ;;  %v1843_v8 = vmax.f32 %v1827_v44, 0.0  ;;  %v1884_v10 = vld [vmem:[#allocation3 + $0x42] sm:$0xff] }
 0x1d4   :  { %v1673_v35 = vpop.f32.mrf.mxu0 }
 0x1d5   :  { %v1703_v60 = vmax.f32 %v1668_v40, %v1670_v31  ;;  %1859 = vst [vmem:[#allocation3 + $0x58] sm:$0xf] %v1843_v8  ;;  %2496 = vmatpush2.bf16.msra.mxu1 %v3694_v59  ;;  %v1674_v38 = vadd.f32 %v1673_v35, %v1521_v9  ;;  %v3712_v59 = vld [vmem:[#allocation8 + $0x180] ss:$8 sps:$4 sm:$0xff]  }
 0x1d6   :  { %v1754_v51 = vld [vmem:[#allocation2 + $0x90] ss:$2 sm:$0xff]  ;;  %v1786_v45 = vld [vmem:[#allocation2 + $0x91] ss:$2 sm:$0xff]  ;;  %v1675_v47 = vpop.f32.mrf.mxu0  ;;  %2497 = vmatprep.subr.bf16.mxu1 %v3699_v28 }
 0x1d7   :  { %v1805_v36 = vmax.f32 %v1754_v51, %v1786_v45  ;;  %1727 = vst [vmem:[#allocation2 + $0xa8] sm:$0xff] %v1703_v60  ;;  %v1676_v46 = vadd.f32 %v1675_v47, %v1523_v58  ;;  %v1889_v28 = vld [vmem:[#allocation3 + $0x13] sm:$0xff]  ;;  %v1890_v51 = vld [vmem:[#allocation3 + $0x23] sm:$0xff] }
 0x1d8   :  { %v1677_v32 = vpop.f32.mrf.mxu0  ;;  %v1907_v58 = vpack.c.bf16 %v1889_v28, %v1888_v30  ;;  %v1891_v60 = vld [vmem:[#allocation3 + $0x33] sm:$0xff] }
 0x1d9   :  { %v1704_v6 = vmax.f32 %v1674_v38, %v1676_v46  ;;  %2498 = vmatpush2.bf16.msra.mxu1 %v3697_v22  ;;  %v4648_v34 = vadd.f32 %v4502_v43, %v1805_v36  ;;  %v1678_v11 = vadd.f32 %v1677_v32, %v1525_v14  ;;  %v1880_v22 = vld [vmem:[#allocation3 + $0x2] sm:$0xff]  ;;  %v1912_v45 = vpack.c.bf16 %v1891_v60, %v1890_v51  ;;  %v1883_v47 = vld [vmem:[#allocation3 + $0x32] sm:$0xff] }
 0x1da   :  { %v1756_v16 = vld [vmem:[#allocation2 + $0xa0] ss:$2 sm:$0xf]  ;;  %v1788_v23 = vld [vmem:[#allocation2 + $0xa1] ss:$2 sm:$0xf]  ;;  %v1679_v48 = vpop.f32.mrf.mxu0  ;;  %2499 = vmatprep.subr.bf16.mxu1 %v3702_v12 }
 0x1db   :  { %v1806_v50 = vmax.f32 %v1756_v16, %v1788_v23  ;;  %1728 = vst [vmem:[#allocation2 + $0xb0] sm:$0xff] %v1704_v6  ;;  %v1680_v15 = vadd.f32 %v1679_v48, %v1527_v42  ;;  %v1844_v39 = vmax.f32 %v4648_v34, 0.0  ;;  %v1882_v36 = vld [vmem:[#allocation3 + $0x22] sm:$0xff]  ;;  %v3715_v23 = vld [vmem:[%s4815_s5 + $0x78] sm:$0xff]  }
 0x1dc   :  { %v1877_v49 = vld [vmem:[#allocation3 + $0x51] sm:$0xff]  ;;  %v1911_v38 = vpack.c.bf16 %v1883_v47, %v1882_v36  ;;  %v1892_v46 = vld [vmem:[#allocation3 + $0x43] sm:$0xff] }
 0x1dd   :  { %v1901_v0 = vld [vmem:[#allocation3 + $0x54] sm:$0xff]  ;;  %v1705_v17 = vmax.f32 %v1678_v11, %v1680_v15  ;;  %v1915_v41 = vpack.c.bf16 %v1877_v49, %v1876_v3  ;;  %2500 = vmatpush2.bf16.msra.mxu1 %v3700_v61  ;;  %v1829_v4 = vadd.f32 %v4502_v43, %v1806_v50  ;;  %1860 = vst [vmem:[#allocation3 + $0x60] sm:$0xff] %v1844_v39 }
 0x1de   :  { %v1918_v62 = vpack.c.bf16 %v1901_v0, %v1900_v55  ;;  %2501 = vmatprep.subr.bf16.mxu1 %v3705_v21  ;;  %v1893_v12 = vld [vmem:[#allocation3 + $0x53] sm:$0xff]  ;;  %v3723_v55 = vld [vmem:[%s4815_s5 + $0x68] sm:$0xff]  }
 0x1df   :  { %1729 = vst [vmem:[#allocation2 + $0xb8] sm:$0xff] %v1705_v17  ;;  %2456 = vmatprep.mubr.bf16.mxu1 %v1915_v41  ;;  %v1845_v52 = vmax.f32 %v1829_v4, 0.0  ;;  %v1917_v32 = vpack.c.bf16 %v1893_v12, %v1892_v46  ;;  %v1885_v57 = vld [vmem:[#allocation3 + $0x52] sm:$0xff]  ;;  %v3724_v0 = vld [vmem:[%s4815_s5 + $0xe8] sm:$0xff]   ;;  %v3729_v4 = vld [vmem:[%s4815_s5 + $0x20] sm:$0xff]  }
 0x1e0   :  { %2603 = vmatmul.mubr.bf16.gmra.mxu0 %v1918_v62  ;;  %2457 = vmatmul.mubr.bf16.gmra.mxu1 %v1914_v56  ;;  %v1916_v42 = vpack.c.bf16 %v1885_v57, %v1884_v10  ;;  %v3716_v48 = vld [vmem:[%s4815_s5 + $0xf8] sm:$0xff]   ;;  %v3719_v15 = vld [vmem:[%s4815_s5 + $0x70] sm:$0xff]   ;;  %v3725_v17 = vld [vmem:[%s4815_s5 + $0x28] sm:$0xff]  }
 0x1e1   :  { %2612 = vmatprep.mubr.bf16.mxu0 %v4844_v25  ;;  %2502 = vmatpush2.bf16.msra.mxu1 %v3703_v53  ;;  %1861 = vst [vmem:[#allocation3 + $0x68] sm:$0xf] %v1845_v52  ;;  %v3717_v50 = vld [vmem:[%s4815_s5 + $0x38] sm:$0xff]   ;;  %v3720_v3 = vld [vmem:[%s4815_s5 + $0xf0] sm:$0xff]   ;;  %v3726_v41 = vld [vmem:[%s4815_s5 + $0xa8] sm:$0xff]  }
 0x1e2   :  { %v1758_v2 = vld [vmem:[#allocation2 + $0xa8] ss:$2 sm:$0xff]  ;;  %v1790_v37 = vld [vmem:[#allocation2 + $0xa9] ss:$2 sm:$0xff]  ;;  %2503 = vmatprep.subr.bf16.mxu1 %v3708_v24  ;;  %v3718_v11 = vld [vmem:[%s4815_s5 + $0xb8] sm:$0xff]   ;;  %3417 = vmatprep.subr.bf16.mxu0 %v3716_v48 }
 0x1e3   :  { %v1807_v18 = vmax.f32 %v1758_v2, %v1790_v37  ;;  %3418 = vmatpush3.bf16.msra.mxu0 %v3718_v11  ;;  %v3722_v49 = vld [vmem:[%s4815_s5 + $0xb0] sm:$0xff]   ;;  %v3727_v62 = vld [vmem:[%s4815_s5 + $0x60] sm:$0xff]   ;;  %v3731_v24 = vld [vmem:[%s4815_s5 + $0x58] sm:$0xff]  }
 0x1e4   :  { %3419 = vmatprep.subr.bf16.mxu0 %v3720_v3  ;;  %v3728_v53 = vld [vmem:[%s4815_s5 + $0xe0] sm:$0xff]   ;;  %v3732_v52 = vld [vmem:[%s4815_s5 + $0xd8] sm:$0xff]   ;;  %v3735_v37 = vld [vmem:[%s4815_s5 + $0x50] sm:$0xff]  }
 0x1e5   :  { %2504 = vmatpush2.bf16.msra.mxu1 %v3706_v20  ;;  %v1830_v26 = vadd.f32 %v4502_v43, %v1807_v18  ;;  %v3730_v56 = vld [vmem:[%s4815_s5 + $0xa0] sm:$0xff]   ;;  %v3733_v20 = vld [vmem:[%s4815_s5 + $0x18] sm:$0xff]   ;;  %v3737_v18 = vld [vmem:[%s4815_s5 + $0x10] sm:$0xff]  }
 0x1e6   :  { %v1760_v13 = vld [vmem:[#allocation2 + $0xb8] ss:$2 sm:$0xf]  ;;  %v1792_v19 = vld [vmem:[#allocation2 + $0xb9] ss:$2 sm:$0xf]  ;;  %2505 = vmatprep.subr.bf16.mxu1 %v3711_v63 }
 0x1e7   :  { %v1808_v5 = vmax.f32 %v1760_v13, %v1792_v19  ;;  %v1846_v44 = vmax.f32 %v1830_v26, 0.0  ;;  %3420 = vmatpush3.bf16.msra.mxu0 %v3722_v49  ;;  %v3734_v2 = vld [vmem:[%s4815_s5 + $0x98] sm:$0xff]   ;;  %v3736_v63 = vld [vmem:[%s4815_s5 + $0xd0] sm:$0xff]   ;;  %v3741_v13 = vld [vmem:[%s4815_s5 + $0x8] sm:$0xff]  }
 0x1e8   :  { %v1878_v29 = vld [vmem:[#allocation3 + $0x61] sm:$0xff]  ;;  %3421 = vmatprep.subr.bf16.mxu0 %v3724_v0  ;;  %v3738_v26 = vld [vmem:[%s4815_s5 + $0x90] sm:$0xff]  }
 0x1e9   :  { %v1831_v25 = vadd.f32 %v4502_v43, %v1808_v5  ;;  %1862 = vst [vmem:[#allocation3 + $0x70] sm:$0xff] %v1846_v44  ;;  %2506 = vmatpush2.bf16.msra.mxu1 %v3709_v54  ;;  %v1902_v31 = vld [vmem:[#allocation3 + $0x64] sm:$0xff]  ;;  %v1919_v9 = vpack.c.bf16 %v1846_v44, %v1844_v39  ;;  %v1881_v43 = vld [vmem:[#allocation3 + $0x12] sm:$0xff] }
 0x1ea   :  { %2507 = vmatprep.subr.bf16.mxu1 %v3714_v1  ;;  %v1906_v27 = vpack.c.bf16 %v1881_v43, %v1880_v22  ;;  %v1894_v6 = vld [vmem:[#allocation3 + $0x63] sm:$0xff]  ;;  %v3721_v39 = vld [vmem:[%s4815_s5 + $0x30] sm:$0xff]  }
 0x1eb   :  { %v1847_v33 = vmax.f32 %v1831_v25, 0.0  ;;  %v1886_v34 = vld [vmem:[#allocation3 + $0x62] sm:$0xff]  ;;  %3422 = vmatpush3.bf16.msra.mxu0 %v3726_v41 }
 0x1ec   :  { %3423 = vmatprep.subr.bf16.mxu0 %v3728_v53  ;;  %v3739_v54 = vld [vmem:[%s4815_s5 + $0x48] sm:$0xff]   ;;  %v3743_v5 = vld [vmem:[%s4815_s5 + $0x40] sm:$0xff]  }
 0x1ed   :  { %1863 = vst [vmem:[#allocation3 + $0x78] sm:$0xf] %v1847_v33  ;;  %2508 = vmatpush2.bf16.msra.mxu1 %v3712_v59  ;;  %v3740_v1 = vld [vmem:[%s4815_s5 + $0xc8] sm:$0xff]   ;;  %v3744_v44 = vld [vmem:[%s4815_s5 + $0xc0] sm:$0xff]   ;;  %v3804_v33 = vmov 0.0  }
 0x1ee   :  { %3395 = vmatprep.subr.bf16.mxu1 %v3715_v23  ;;  %v3742_v19 = vld [vmem:[%s4815_s5 + $0x88] sm:$0xff]   ;;  %v3745_v25 = vld [vmem:[%s4815_s5] sm:$0xff]  }
 0x1ef   :  { %3424 = vmatpush3.bf16.msra.mxu0 %v3730_v56  ;;  %v3746_v59 = vld [vmem:[%s4815_s5 + $0x80] sm:$0xff]  }
 0x1f0   :  { %3425 = vmatprep.subr.bf16.mxu0 %v3732_v52 }
 0x1f3   :  { %3426 = vmatpush3.bf16.msra.mxu0 %v3734_v2 }
 0x1f4   :  { %v1879_v40 = vld [vmem:[#allocation3 + $0x71] sm:$0xff]  ;;  %3427 = vmatprep.subr.bf16.mxu0 %v3736_v63 }
 0x1f5   :  { %v1903_v8 = vld [vmem:[#allocation3 + $0x74] sm:$0xff]  ;;  %v1920_v35 = vpack.c.bf16 %v1879_v40, %v1878_v29 }
 0x1f6   :  { %v1923_v7 = vpack.c.bf16 %v1903_v8, %v1902_v31  ;;  %v1895_v14 = vld [vmem:[#allocation3 + $0x73] sm:$0xff] }
 0x1f7   :  { %2466 = vmatprep.mubr.bf16.mxu1 %v1920_v35  ;;  %v1922_v61 = vpack.c.bf16 %v1895_v14, %v1894_v6  ;;  %v1887_v21 = vld [vmem:[#allocation3 + $0x72] sm:$0xff]  ;;  %3428 = vmatpush3.bf16.msra.mxu0 %v3738_v26 }
 0x1f8   :  { %2613 = vmatmul.mubr.bf16.gmra.mxu0 %v1923_v7  ;;  %2467 = vmatmul.mubr.bf16.gmra.mxu1 %v1919_v9  ;;  %v1921_v16 = vpack.c.bf16 %v1887_v21, %v1886_v34 }
 0x1f9   :  { %2509 = vmatprep.mubr.bf16.mxu1 %v1907_v58  ;;  %3429 = vmatprep.subr.bf16.mxu0 %v3740_v1 }
 0x1fb   :  { %3430 = vmatpush3.bf16.msra.mxu0 %v3742_v19 }
 0x1fc   :  { %3431 = vmatprep.subr.bf16.mxu0 %v3744_v44 }
 0x1ff   :  { %3432 = vmatpush3.bf16.msra.mxu0 %v3746_v59 }
 0x200   :  { %2510 = vmatmul.mubr.bf16.vlgmr.msra.gmra.mxu1 %v1906_v27 }
 0x201   :  { %2519 = vmatprep.mubr.bf16.mxu1 %v1912_v45  ;;  %3396 = vmatpush3.bf16.msra.mxu1 %v3717_v50 }
 0x202   :  { %3397 = vmatprep.subr.bf16.mxu1 %v3719_v15 }
 0x205   :  { %3398 = vmatpush3.bf16.msra.mxu1 %v3721_v39 }
 0x206   :  { %3399 = vmatprep.subr.bf16.mxu1 %v3723_v55 }
 0x208   :  { %2520 = vmatmul.mubr.bf16.gmra.mxu1 %v1911_v38 }
 0x209   :  { %2529 = vmatprep.mubr.bf16.mxu1 %v1917_v32  ;;  %3400 = vmatpush3.bf16.msra.mxu1 %v3725_v17 }
 0x20a   :  { %3401 = vmatprep.subr.bf16.mxu1 %v3727_v62 }
 0x20d   :  { %3402 = vmatpush3.bf16.msra.mxu1 %v3729_v4 }
 0x20e   :  { %3403 = vmatprep.subr.bf16.mxu1 %v3731_v24 }
 0x210   :  { %2530 = vmatmul.mubr.bf16.gmra.mxu1 %v1916_v42 }
 0x211   :  { %2539 = vmatprep.mubr.bf16.mxu1 %v1922_v61  ;;  %3404 = vmatpush3.bf16.msra.mxu1 %v3733_v20 }
 0x212   :  { %3405 = vmatprep.subr.bf16.mxu1 %v3735_v37 }
 0x215   :  { %3406 = vmatpush3.bf16.msra.mxu1 %v3737_v18 }
 0x216   :  { %3407 = vmatprep.subr.bf16.mxu1 %v3739_v54 }
 0x218   :  { %2540 = vmatmul.mubr.bf16.gmra.mxu1 %v1921_v16 }
 0x219   :  { %3408 = vmatpush3.bf16.msra.mxu1 %v3741_v13 }
 0x21a   :  { %3409 = vmatprep.subr.bf16.mxu1 %v3743_v5 }
 0x21d   :  { %3410 = vmatpush3.bf16.msra.mxu1 %v3745_v25 }
 0x21e   :  { %3448 = vmatprep.subr.bf16.mxu1 %v3804_v33 }
 0x270   :  { %v2438_v29 = vpop.f32.mrf.mxu1  ;;  %v2584_v30 = vpop.f32.mrf.mxu0 }
 0x272   :  { %v2440_v28 = vpop.f32.mrf.mxu1  ;;  %v2586_v43 = vpop.f32.mrf.mxu0 }
 0x274   :  { %v2442_v40 = vpop.f32.mrf.mxu1  ;;  %v2588_v22 = vpop.f32.mrf.mxu0 }
 0x276   :  { %v2444_v31 = vpop.f32.mrf.mxu1  ;;  %v2590_v51 = vpop.f32.mrf.mxu0 }
 0x288   :  { %v2448_v8 = vpop.f32.mrf.mxu1  ;;  %v2594_v47 = vpop.f32.mrf.mxu0 }
 0x28a   :  { %v2450_v35 = vpop.f32.mrf.mxu1  ;;  %v2596_v38 = vpop.f32.mrf.mxu0 }
 0x28c   :  { %v2452_v7 = vpop.f32.mrf.mxu1  ;;  %v2598_v57 = vpop.f32.mrf.mxu0 }
 0x28e   :  { %v2454_v9 = vpop.f32.mrf.mxu1  ;;  %v2600_v61 = vpop.f32.mrf.mxu0 }
 0x2a0   :  { %v2458_v58 = vpop.f32.mrf.mxu1  ;;  %v2604_v48 = vpop.f32.mrf.mxu0 }
 0x2a2   :  { %v2460_v60 = vpop.f32.mrf.mxu1  ;;  %v2606_v0 = vpop.f32.mrf.mxu0 }
 0x2a4   :  { %v2462_v27 = vpop.f32.mrf.mxu1  ;;  %v2608_v52 = vpop.f32.mrf.mxu0 }
 0x2a6   :  { %v2464_v45 = vpop.f32.mrf.mxu1  ;;  %v2610_v1 = vpop.f32.mrf.mxu0 }
 0x2b8   :  { %v4754_v12 = vpop.f32.mrf.mxu1  ;;  %v2614_v44 = vpop.f32.mrf.mxu0 }
 0x2ba   :  { %v4756_v36 = vpop.f32.mrf.mxu1 }
 0x2bc   :  { %v4758_v46 = vpop.f32.mrf.mxu1 }
 0x2be   :  { %v4760_v32 = vpop.f32.mrf.mxu1 }
 0x2c0   :  { %v2511_v14 = vpop.f32.mrf.mxu1 }
 0x2c1   :  { %v2512_v10 = vadd.f32 %v2511_v14, %v2438_v29 }
 0x2c2   :  { %v2513_v42 = vpop.f32.mrf.mxu1 }
 0x2c3   :  { %v2514_v6 = vadd.f32 %v2513_v42, %v2440_v28  ;;  %v2585_v34 = vadd.f32 %v2584_v30, %v2512_v10  ;;  %v3352_v28 = vld [vmem:[%s4814_s4] ss:$0 sm:$0xff] }
 0x2c4   :  { %v2515_v21 = vpop.f32.mrf.mxu1 }
 0x2c5   :  { %v2587_v16 = vadd.f32 %v2586_v43, %v2514_v6  ;;  %v2516_v23 = vadd.f32 %v2515_v21, %v2442_v40  ;;  %v2616_v43 = vpop.f32.mrf.mxu0 }
 0x2c6   :  { %v2517_v50 = vpop.f32.mrf.mxu1 }
 0x2c7   :  { %v2623_v11 = vmax.f32 %v2585_v34, %v2587_v16  ;;  %v2518_v15 = vadd.f32 %v2517_v50, %v2444_v31  ;;  %v2589_v39 = vadd.f32 %v2588_v22, %v2516_v23  ;;  %v2618_v42 = vpop.f32.mrf.mxu0 }
 0x2c8   :  { %v2521_v3 = vpop.f32.mrf.mxu1 }
 0x2c9   :  { %2631 = vst [vmem:[#allocation4] sm:$0xff] %v2623_v11  ;;  %v2591_v49 = vadd.f32 %v2590_v51, %v2518_v15  ;;  %v2522_v55 = vadd.f32 %v2521_v3, %v2448_v8  ;;  %v2620_v11 = vpop.f32.mrf.mxu0 }
 0x2ca   :  { %v2523_v17 = vpop.f32.mrf.mxu1 }
 0x2cb   :  { %v2624_v41 = vmax.f32 %v2589_v39, %v2591_v49  ;;  %v2524_v62 = vadd.f32 %v2523_v17, %v2450_v35  ;;  %v2595_v4 = vadd.f32 %v2594_v47, %v2522_v55 }
 0x2cc   :  { %v2525_v53 = vpop.f32.mrf.mxu1 }
 0x2cd   :  { %2632 = vst [vmem:[#allocation4 + $0x8] sm:$0xff] %v2624_v41  ;;  %v2597_v56 = vadd.f32 %v2596_v38, %v2524_v62  ;;  %v2526_v24 = vadd.f32 %v2525_v53, %v2452_v7 }
 0x2ce   :  { %v2527_v20 = vpop.f32.mrf.mxu1 }
 0x2cf   :  { %v2625_v2 = vmax.f32 %v2595_v4, %v2597_v56  ;;  %v2528_v37 = vadd.f32 %v2527_v20, %v2454_v9  ;;  %v2599_v18 = vadd.f32 %v2598_v57, %v2526_v24 }
 0x2d0   :  { %v2531_v63 = vpop.f32.mrf.mxu1 }
 0x2d1   :  { %2633 = vst [vmem:[#allocation4 + $0x10] sm:$0xff] %v2625_v2  ;;  %v2601_v26 = vadd.f32 %v2600_v61, %v2528_v37  ;;  %v2532_v54 = vadd.f32 %v2531_v63, %v2458_v58 }
 0x2d2   :  { %v2533_v13 = vpop.f32.mrf.mxu1 }
 0x2d3   :  { %v2626_v19 = vmax.f32 %v2599_v18, %v2601_v26  ;;  %v2534_v5 = vadd.f32 %v2533_v13, %v2460_v60  ;;  %v2605_v31 = vadd.f32 %v2604_v48, %v2532_v54  ;;  %v3747_v18 = vld [vmem:[%s4817_s7 + $0x38] sm:$0xff]   ;;  %v3748_v54 = vld [vmem:[%s4817_s7 + $0x30] sm:$0xff]   ;;  %v3750_v13 = vld [vmem:[%s4817_s7 + $0x20] sm:$0xff]  }
 0x2d4   :  { %v2639_v25 = vld [vmem:[#allocation4] ss:$2 sm:$0xff]  ;;  %v2647_v59 = vld [vmem:[#allocation4 + $0x1] ss:$2 sm:$0xff]  ;;  %v2535_v29 = vpop.f32.mrf.mxu1 }
 0x2d5   :  { %v2654_v40 = vmax.f32 %v2639_v25, %v2647_v59  ;;  %2634 = vst [vmem:[#allocation4 + $0x18] sm:$0xff] %v2626_v19  ;;  %v2607_v8 = vadd.f32 %v2606_v0, %v2534_v5  ;;  %v2536_v35 = vadd.f32 %v2535_v29, %v2462_v27  ;;  %v3751_v19 = vld [vmem:[%s4817_s7 + $0x18] sm:$0xff]   ;;  %v3752_v5 = vld [vmem:[%s4817_s7 + $0x10] sm:$0xff]   ;;  %v3754_v25 = vld [vmem:[%s4817_s7] sm:$0xff]  }
 0x2d6   :  { %v2537_v7 = vpop.f32.mrf.mxu1 }
 0x2d7   :  { %v2627_v9 = vmax.f32 %v2605_v31, %v2607_v8  ;;  %v2538_v30 = vadd.f32 %v2537_v7, %v2464_v45  ;;  %v2665_v58 = vadd.f32 %v3352_v28, %v2654_v40  ;;  %v2609_v60 = vadd.f32 %v2608_v52, %v2536_v35 }
 0x2d8   :  { %v2541_v22 = vpop.f32.mrf.mxu1 }
 0x2d9   :  { %2635 = vst [vmem:[#allocation4 + $0x20] sm:$0xff] %v2627_v9  ;;  %v2611_v51 = vadd.f32 %v2610_v1, %v2538_v30  ;;  %v2542_v47 = vadd.f32 %v2541_v22, %v4754_v12  ;;  %v2669_v38 = vmax.f32 %v2665_v58, 0.0  ;;  %v3749_v1 = vld [vmem:[%s4817_s7 + $0x28] sm:$0xff]  }
 0x2da   :  { %v2543_v57 = vpop.f32.mrf.mxu1 }
 0x2db   :  { %v2628_v14 = vmax.f32 %v2609_v60, %v2611_v51  ;;  %v2544_v10 = vadd.f32 %v2543_v57, %v4756_v36  ;;  %2673 = vst [vmem:[#allocation5] sm:$0xff] %v2669_v38  ;;  %v2615_v45 = vadd.f32 %v2614_v44, %v2542_v47  ;;  %v3753_v44 = vld [vmem:[%s4817_s7 + $0x8] sm:$0xff]  }
 0x2dc   :  { %v2641_v6 = vld [vmem:[#allocation4 + $0x10] ss:$2 sm:$0xff]  ;;  %v2649_v27 = vld [vmem:[#allocation4 + $0x11] ss:$2 sm:$0xff]  ;;  %v2545_v61 = vpop.f32.mrf.mxu1 }
 0x2dd   :  { %v2655_v21 = vmax.f32 %v2641_v6, %v2649_v27  ;;  %2636 = vst [vmem:[#allocation4 + $0x28] sm:$0xff] %v2628_v14  ;;  %v2617_v34 = vadd.f32 %v2616_v43, %v2544_v10  ;;  %v2546_v16 = vadd.f32 %v2545_v61, %v4758_v46 }
 0x2de   :  { %v2547_v23 = vpop.f32.mrf.mxu1 }
 0x2df   :  { %v2629_v48 = vmax.f32 %v2615_v45, %v2617_v34  ;;  %v2548_v12 = vadd.f32 %v2547_v23, %v4760_v32  ;;  %v2666_v50 = vadd.f32 %v3352_v28, %v2655_v21  ;;  %v2619_v15 = vadd.f32 %v2618_v42, %v2546_v16 }
 0x2e1   :  { %2637 = vst [vmem:[#allocation4 + $0x30] sm:$0xff] %v2629_v48  ;;  %v2621_v36 = vadd.f32 %v2620_v11, %v2548_v12  ;;  %v2670_v3 = vmax.f32 %v2666_v50, 0.0 }
 0x2e3   :  { %v2630_v39 = vmax.f32 %v2619_v15, %v2621_v36  ;;  %2674 = vst [vmem:[#allocation5 + $0x8] sm:$0xff] %v2670_v3 }
 0x2e4   :  { %v2643_v49 = vld [vmem:[#allocation4 + $0x20] ss:$2 sm:$0xff]  ;;  %v2651_v55 = vld [vmem:[#allocation4 + $0x21] ss:$2 sm:$0xff] }
 0x2e5   :  { %v2656_v0 = vmax.f32 %v2643_v49, %v2651_v55  ;;  %2638 = vst [vmem:[#allocation4 + $0x38] sm:$0xff] %v2630_v39 }
 0x2e7   :  { %v2667_v17 = vadd.f32 %v3352_v28, %v2656_v0 }
 0x2e9   :  { %v2671_v41 = vmax.f32 %v2667_v17, 0.0 }
 0x2eb   :  { %2675 = vst [vmem:[#allocation5 + $0x10] sm:$0xff] %v2671_v41 }
 0x2ec   :  { %v2645_v46 = vld [vmem:[#allocation4 + $0x30] ss:$2 sm:$0xff]  ;;  %v2653_v62 = vld [vmem:[#allocation4 + $0x31] ss:$2 sm:$0xff] }
 0x2ed   :  { %v2657_v53 = vmax.f32 %v2645_v46, %v2653_v62 }
 0x2ef   :  { %v2668_v4 = vadd.f32 %v3352_v28, %v2657_v53  ;;  %v3353_v28 = vld [vmem:[%s4816_s6] ss:$0 sm:$0xff] }
 0x2f1   :  { %v2672_v32 = vmax.f32 %v2668_v4, 0.0 }
 0x2f3   :  { %2676 = vst [vmem:[#allocation5 + $0x18] sm:$0xff] %v2672_v32 }
 0x2fa   :  { %v2679_v56 = vld [vmem:[#allocation5 + $0x1] ss:$4 sm:$0xff]  ;;  %v2683_v24 = vld [vmem:[#allocation5 + $0x3] ss:$4 sm:$0xff]  ;;  %v2677_v52 = vld [vmem:[#allocation5] ss:$4 sm:$0xff] }
 0x2fb   :  { %v2685_v20 = vpack.c.bf16 %v2679_v56, %v2679_v56  ;;  %v2687_v2 = vpack.c.bf16 %v2683_v24, %v2683_v24  ;;  %v2684_v37 = vpack.c.bf16 %v2677_v52, %v2677_v52  ;;  %v2681_v63 = vld [vmem:[#allocation5 + $0x2] ss:$4 sm:$0xff] }
 0x2fc   :  { %v2686_v26 = vpack.c.bf16 %v2681_v63, %v2681_v63 }
 0x2fd   :  { %2983 = vmatprep.mubr.bf16.mxu1 %v2685_v20  ;;  %3023 = vmatprep.mubr.bf16.mxu0 %v2687_v2 }
 0x2fe   :  { %2984 = vmatmul.mubr.bf16.vlgmr.msra.gmra.mxu1 %v2684_v37  ;;  %3024 = vmatmul.mubr.bf16.vlgmr.msra.gmra.mxu0 %v2686_v26 }
 0x2ff   :  { %3449 = vmatpush3.bf16.msra.mxu1 %v3747_v18  ;;  %3464 = vmatprep.mubr.msk.bf16.mxu1 %vm3805_vm1, %v3804_v33 }
 0x300   :  { %3450 = vmatprep.subr.bf16.mxu1 %v3804_v33 }
 0x303   :  { %3451 = vmatpush3.bf16.msra.mxu1 %v3748_v54 }
 0x304   :  { %3452 = vmatprep.subr.bf16.mxu1 %v3804_v33 }
 0x307   :  { %3453 = vmatpush3.bf16.msra.mxu1 %v3749_v1 }
 0x308   :  { %3454 = vmatprep.subr.bf16.mxu1 %v3804_v33 }
 0x30b   :  { %3455 = vmatpush3.bf16.msra.mxu1 %v3750_v13 }
 0x30c   :  { %3456 = vmatprep.subr.bf16.mxu1 %v3804_v33 }
 0x30f   :  { %3457 = vmatpush3.bf16.msra.mxu1 %v3751_v19 }
 0x310   :  { %3458 = vmatprep.subr.bf16.mxu1 %v3804_v33 }
 0x313   :  { %3459 = vmatpush3.bf16.msra.mxu1 %v3752_v5 }
 0x314   :  { %3460 = vmatprep.subr.bf16.mxu1 %v3804_v33 }
 0x317   :  { %3461 = vmatpush3.bf16.msra.mxu1 %v3753_v44 }
 0x318   :  { %3462 = vmatprep.subr.bf16.mxu1 %v3804_v33  ;;  %v3386_v33 = vld [vmem:[%s4818_s8] ss:$0 sm:$0xff] }
 0x31b   :  { %3463 = vmatpush3.bf16.msra.mxu1 %v3754_v25 }
 0x3be   :  { %v3411_v59 = vpop.f32.mrf.mxu1  ;;  %v3433_v29 = vpop.f32.mrf.mxu0 }
 0x3c0   :  { %v3412_v40 = vpop.f32.mrf.mxu1  ;;  %v3434_v31 = vpop.f32.mrf.mxu0 }
 0x3c1   :  { %v3413_v8 = vadd.f32 %v3412_v40, %v3411_v59  ;;  %v3435_v30 = vadd.f32 %v3434_v31, %v3433_v29 }
 0x3c2   :  { %v3414_v35 = vpop.f32.mrf.mxu1  ;;  %v3436_v7 = vpop.f32.mrf.mxu0 }
 0x3c3   :  { %v2986_v9 = vadd.f32 %v3413_v8, %v3353_v28 }
 0x3c4   :  { %v3415_v58 = vpop.f32.mrf.mxu1  ;;  %v3437_v43 = vpop.f32.mrf.mxu0 }
 0x3c5   :  { %v3026_v22 = vadd.f32 %v3435_v30, %v2986_v9 }
 0x3c7   :  { %v3031_v60 = vmax.f32 %v3026_v22, 0.0 }
 0x3c9   :  { %v3032_v51 = vpack.c.bf16 %v3031_v60, %v3031_v60 }
 0x3cb   :  { %3465 = vmatmul.mubr.bf16.vlgmr.msra.gmra.mxu1 %v3032_v51 }
 0x48b   :  { %v3138_v47 = vpop.f32.mrf.mxu1 }
 0x48c   :  { %v3139_v38 = vadd.f32 %v3386_v33, %v3138_v47 }
 0x48d   :  { %v3466_v57 = vpop.f32.mrf.mxu1 }
 0x48e   :  { %3144 = vst [vmem:[%s4819_s9] sm:$0xff] %v3139_v38 }
 0x48f   :  { %v3141_v14 = vpop.f32.mrf.mxu1 }
 0x491   :  { %v3467_v10 = vpop.f32.mrf.mxu1 }
 0x492   :  { %3149 = vsyncpa [#allocation7], 1 }
 0x493   :  { %3150 = vsyncpa [#allocation9], 1 }

</bundles_post_ra>
